<compile_context>
chip_gen: v6e
topology: v6e:2x2x1
jax: 0.10.0
libtpu: 0.0.40
codegen_flags: <defaults>
</compile_context>

<pallas_src>
import functools

import jax
import jax.numpy as jnp
import numpy as np
from jax.experimental import pallas as pl
from jax.experimental.pallas import tpu as pltpu

SUPPORT_LEN = 3
ORDER = 2


def adaptive_gcn_kernel(x_ref, p_ref, w_ref, b_ref, o_ref, *, n_blocks, C, V, TB):
    """One grid step = TB batch*time slices.

    x_ref : (1, V, C*TB)            input tile, rows = nodes, cols = (channel, bt)
    p_ref : (n_blocks*V, V)         stacked [I; A^T; (A^T)^2; ...]  (grid-invariant)
    w_ref : (c_out, n_blocks*C)     1x1-conv weight, cols ordered (block, channel)
    b_ref : (c_out, 1)              bias (f32)
    o_ref : (1, c_out, V*TB)        lane-dense output slab
    """
    x = x_ref[0]                                                     # (V, C*TB)

    # Stage 1: identity + all S*order graph propagations as ONE tall MXU matmul.
    h = jnp.dot(p_ref[...], x, preferred_element_type=jnp.float32)  # (n_blocks*V, C*TB) f32

    # Relayout rows (k, v) / cols (c, b)  ->  rows (k, c) / cols (v, b) so the
    # 1x1 conv is a single K = n_blocks*C matmul.  Stays in VMEM/vregs.
    h = h.reshape(n_blocks, V, C, TB).transpose(0, 2, 1, 3).reshape(n_blocks * C, V * TB)
    h = h.astype(w_ref.dtype)

    # Stage 2: fused projection (1x1 conv) + bias.
    out = jnp.dot(w_ref[...], h, preferred_element_type=jnp.float32)  # (c_out, V*TB) f32
    o_ref[0] = (out + b_ref[...]).astype(o_ref.dtype)


def _round_up(x, m):
    return -(-x // m) * m


def _choose_tile_b(B, *, C, V, c_out, n_blocks, in_itemsize, out_itemsize,
                   vmem_budget_bytes=24 << 20):
    """Pick a lane-dense (multiple-of-128) batch*time tile width.

    Sized against a ~24 MiB per-tile VMEM estimate (double-buffered x/out tiles,
    double-buffered grid-invariant operands, f32 intermediates) so it fits the
    default scoped VMEM on v5e/v6e/v7x without an explicit vmem_limit_bytes.
    On v7x, prefer shapes where the resulting grid length is even (2 TCs).
    """
    b_pad_min = _round_up(max(B, 1), 128)
    for tb in (512, 384, 256, 128):
        if tb > b_pad_min:           # never make the tile wider than the padded problem
            continue
        x_tile = 2 * C * V * tb * in_itemsize                 # double-buffered input
        o_tile = 2 * c_out * V * tb * out_itemsize            # double-buffered output
        consts = 2 * (n_blocks * V * V + c_out * n_blocks * C) * in_itemsize + 2 * c_out * 4
        live = 4 * (2 * n_blocks * C * V * tb + c_out * V * tb)  # f32 intermediates
        if x_tile + o_tile + consts + live <= vmem_budget_bytes:
            return tb
    return 128


@functools.partial(jax.jit, static_argnames=("block_b", "compute_dtype"))
def adaptive_gcn_pallas(x, supports, weight, bias, *, block_b=None,
                        compute_dtype=jnp.bfloat16):
    """x: (N, C, V, L); supports: (S, V, V); weight: (c_out, n_blocks*C, 1, 1); bias: (c_out,)."""
    N, C, V, L = x.shape
    S = supports.shape[0]
    c_out = weight.shape[0]
    n_blocks = ORDER * S + 1
    assert weight.shape[1] == n_blocks * C

    B = N * L
    in_itemsize = jnp.dtype(compute_dtype).itemsize
    out_itemsize = jnp.dtype(x.dtype).itemsize
    TB = (_choose_tile_b(B, C=C, V=V, c_out=c_out, n_blocks=n_blocks,
                         in_itemsize=in_itemsize, out_itemsize=out_itemsize)
          if block_b is None else block_b)
    B_pad = _round_up(B, TB)
    T = B_pad // TB

    # ---- one-time packing to kernel-friendly layouts (plain JAX glue) ----
    # Stacked propagation operator: [I; A1^T; (A1^T)^2; A2^T; ...] -> (n_blocks*V, V).
    at = jnp.swapaxes(supports.astype(jnp.float32), 1, 2)            # (S, V, V) = A^T
    blocks = [jnp.eye(V, dtype=jnp.float32)]
    for s in range(S):
        p = at[s]
        cur = p
        blocks.append(cur)
        for _ in range(2, ORDER + 1):
            cur = cur @ p                                            # (A^T)^r
            blocks.append(cur)
    pall = jnp.concatenate(blocks, axis=0).astype(compute_dtype)     # (n_blocks*V, V)

    # x (N, C, V, L) -> (T, V, C*TB), zero-padded along the flattened b = n*L + l axis.
    xp = jnp.transpose(x.astype(compute_dtype), (1, 2, 0, 3)).reshape(C, V, B)
    if B_pad != B:
        xp = jnp.pad(xp, ((0, 0), (0, 0), (0, B_pad - B)))
    xp = xp.reshape(C, V, T, TB)
    xp = jnp.transpose(xp, (2, 1, 0, 3)).reshape(T, V, C * TB)       # (T, V, C*TB)

    w2d = weight[:, :, 0, 0].astype(compute_dtype)                   # (c_out, n_blocks*C)
    b2 = bias.astype(jnp.float32).reshape(c_out, 1)

    kernel = functools.partial(adaptive_gcn_kernel,
                               n_blocks=n_blocks, C=C, V=V, TB=TB)

    out_packed = pl.pallas_call(
        kernel,
        out_shape=jax.ShapeDtypeStruct((T, c_out, V * TB), x.dtype),
        grid_spec=pltpu.PrefetchScalarGridSpec(
            num_scalar_prefetch=0,
            grid=(T,),
            in_specs=[
                pl.BlockSpec((1, V, C * TB), lambda t: (t, 0, 0)),
                pl.BlockSpec((n_blocks * V, V), lambda t: (0, 0)),
                pl.BlockSpec((c_out, n_blocks * C), lambda t: (0, 0)),
                pl.BlockSpec((c_out, 1), lambda t: (0, 0)),
            ],
            out_specs=pl.BlockSpec((1, c_out, V * TB), lambda t: (t, 0, 0)),
        ),
        compiler_params=pltpu.CompilerParams(
            dimension_semantics=("parallel",)),
    )(xp, pall, w2d, b2)

    # Un-pack: (T, c_out, V*TB) -> (N, c_out, V, L), dropping the padded columns.
    out = out_packed.reshape(T, c_out, V, TB)
    out = jnp.transpose(out, (1, 2, 0, 3)).reshape(c_out, V, B_pad)[:, :, :B]
    out = out.reshape(c_out, V, N, L)
    out = jnp.transpose(out, (2, 0, 1, 3))                           # (N, c_out, V, L)
    # TODO(synk): F.dropout omitted (eval-mode identity); add a stochastic mask
    # via pltpu.prng_random_bits if training-mode dropout is ever needed.
    return out


def adaptive_gcn_reference(x, supports, weight, bias):
    """Pure-JAX reference matching the PyTorch forward (eval mode)."""
    out = [x]
    for s in range(supports.shape[0]):
        a = supports[s]
        x1 = jnp.einsum('ncvl,vw->ncwl', x, a)
        out.append(x1)
        for _ in range(2, ORDER + 1):
            x2 = jnp.einsum('ncvl,vw->ncwl', x1, a)
            out.append(x2)
            x1 = x2
    h = jnp.concatenate(out, axis=1)
    w2d = weight[:, :, 0, 0]
    y = jnp.einsum('oc,ncvl->novl', w2d, h) + bias[None, :, None, None]
    return y


if __name__ == "__main__":
    # Small shapes implied by the forward: batch=2, c_in=4, nodes=16, seq=8.
    N, C_IN, V, L = 2, 4, 16, 8
    C_OUT = 32
    C_IN_TOT = (ORDER * SUPPORT_LEN + 1) * C_IN   # 28

    key = jax.random.PRNGKey(0)
    kx, ka, kw, kb = jax.random.split(key, 4)

    x = jax.random.normal(kx, (N, C_IN, V, L), dtype=jnp.float32)
    # Row-normalized random supports (adjacency-like), deterministic.
    supports_raw = jax.random.uniform(ka, (SUPPORT_LEN, V, V), dtype=jnp.float32)
    supports = supports_raw / jnp.sum(supports_raw, axis=-1, keepdims=True)
    # Conv2d(7*C, c_out, 1x1) parameters, deterministic init.
    weight = 0.1 * jax.random.normal(kw, (C_OUT, C_IN_TOT, 1, 1), dtype=jnp.float32)
    bias = 0.1 * jax.random.normal(kb, (C_OUT,), dtype=jnp.float32)

    y_ref = adaptive_gcn_reference(x, supports, weight, bias)

    # Exactness check of the packing/tiling plumbing with f32 MXU operands.
    y_f32 = jax.block_until_ready(
        adaptive_gcn_pallas(x, supports, weight, bias, compute_dtype=jnp.float32))
    np.testing.assert_allclose(np.asarray(y_f32), np.asarray(y_ref),
                               rtol=1e-4, atol=1e-4)

    # Default path: bf16 MXU operands, f32 accumulation.
    y_bf16 = jax.block_until_ready(
        adaptive_gcn_pallas(x, supports, weight, bias))
    np.testing.assert_allclose(np.asarray(y_bf16), np.asarray(y_ref),
                               rtol=5e-2, atol=5e-2)

    print("KERNEL_OK")
</pallas_src>

<mosaic_0001>
module attributes {stable_mosaic.version = 11 : i64} {
  func.func @adaptive_gcn_kernel(%arg0: i32, %arg1: memref<1x16x512xf32, #tpu.memory_space<vmem>>, %arg2: memref<112x16xf32, #tpu.memory_space<vmem>>, %arg3: memref<32x28xf32, #tpu.memory_space<vmem>>, %arg4: memref<32x1xf32, #tpu.memory_space<vmem>>, %arg5: memref<1x32x2048xf32, #tpu.memory_space<vmem>>) attributes {dimension_semantics = [#tpu.dimension_semantics<parallel>], iteration_bounds = array<i64: 1>, scalar_prefetch = 0 : i64, scratch_operands = 0 : i64, tpu.core_type = #tpu.core_type<tc>, window_params = [{transform_indices = @transform_0, window_bounds = array<i64: 1, 16, 512>}, {pipeline_mode = #tpu.pipeline_mode<synchronous>, transform_indices = @transform_1, window_bounds = array<i64: 112, 16>}, {pipeline_mode = #tpu.pipeline_mode<synchronous>, transform_indices = @transform_2, window_bounds = array<i64: 32, 28>}, {pipeline_mode = #tpu.pipeline_mode<synchronous>, transform_indices = @transform_3, window_bounds = array<i64: 32, 1>}, {transform_indices = @transform_4, window_bounds = array<i64: 1, 32, 2048>}]} {
    %c0 = arith.constant 0 : index
    %c0_0 = arith.constant 0 : index
    %c0_1 = arith.constant 0 : index
    %0 = vector.load %arg1[%c0, %c0_0, %c0_1] : memref<1x16x512xf32, #tpu.memory_space<vmem>>, vector<1x16x512xf32>
    %1 = vector.shape_cast %0 : vector<1x16x512xf32> to vector<16x512xf32>
    %c0_2 = arith.constant 0 : index
    %c0_3 = arith.constant 0 : index
    %2 = vector.load %arg2[%c0_2, %c0_3] : memref<112x16xf32, #tpu.memory_space<vmem>>, vector<112x16xf32>
    %cst = arith.constant dense<0.000000e+00> : vector<112x512xf32>
    %3 = tpu.matmul %2, %1, %cst {dimension_numbers = #tpu.dot_dimension_numbers<[1], [0], [0], [1], [0, 0, 1, 1], [], []>} : vector<112x16xf32>, vector<16x512xf32>, vector<112x512xf32> -> vector<112x512xf32>
    %4 = vector.shape_cast %3 : vector<112x512xf32> to vector<7x16x4x128xf32>
    %5 = tpu.transpose %4, [0, 2, 1, 3] : vector<7x16x4x128xf32> -> vector<7x4x16x128xf32>
    %6 = vector.shape_cast %5 : vector<7x4x16x128xf32> to vector<28x2048xf32>
    %c0_4 = arith.constant 0 : index
    %c0_5 = arith.constant 0 : index
    %7 = vector.load %arg3[%c0_4, %c0_5] : memref<32x28xf32, #tpu.memory_space<vmem>>, vector<32x28xf32>
    %cst_6 = arith.constant dense<0.000000e+00> : vector<32x2048xf32>
    %8 = tpu.matmul %7, %6, %cst_6 {dimension_numbers = #tpu.dot_dimension_numbers<[1], [0], [0], [1], [0, 0, 1, 1], [], []>} : vector<32x28xf32>, vector<28x2048xf32>, vector<32x2048xf32> -> vector<32x2048xf32>
    %c0_7 = arith.constant 0 : index
    %c0_8 = arith.constant 0 : index
    %9 = vector.load %arg4[%c0_7, %c0_8] : memref<32x1xf32, #tpu.memory_space<vmem>>, vector<32x1xf32>
    %10 = vector.broadcast %9 : vector<32x1xf32> to vector<32x2048xf32>
    %11 = arith.addf %8, %10 : vector<32x2048xf32>
    %c0_9 = arith.constant 0 : index
    %c0_10 = arith.constant 0 : index
    %c0_11 = arith.constant 0 : index
    %12 = vector.load %arg5[%c0_9, %c0_10, %c0_11] : memref<1x32x2048xf32, #tpu.memory_space<vmem>>, vector<1x32x2048xf32>
    %13 = vector.shape_cast %12 : vector<1x32x2048xf32> to vector<32x2048xf32>
    %14 = vector.shape_cast %11 : vector<32x2048xf32> to vector<1x32x2048xf32>
    tpu.vector_store %arg5[%c0_9, %c0_10, %c0_11], %14 {strides = array<i32>} : memref<1x32x2048xf32, #tpu.memory_space<vmem>>, vector<1x32x2048xf32>,
    return
  }
  func.func @transform_0(%arg0: i32) -> (i32, i32, i32) {
    %c0_i32 = arith.constant 0 : i32
    %c0_i32_0 = arith.constant 0 : i32
    %c0_i32_1 = arith.constant 0 : i32
    return %arg0, %c0_i32, %c0_i32_0 : i32, i32, i32
  }
  func.func @transform_1(%arg0: i32) -> (i32, i32) {
    %c0_i32 = arith.constant 0 : i32
    %c0_i32_0 = arith.constant 0 : i32
    %c0_i32_1 = arith.constant 0 : i32
    return %c0_i32, %c0_i32_0 : i32, i32
  }
  func.func @transform_2(%arg0: i32) -> (i32, i32) {
    %c0_i32 = arith.constant 0 : i32
    %c0_i32_0 = arith.constant 0 : i32
    %c0_i32_1 = arith.constant 0 : i32
    return %c0_i32, %c0_i32_0 : i32, i32
  }
  func.func @transform_3(%arg0: i32) -> (i32, i32) {
    %c0_i32 = arith.constant 0 : i32
    %c0_i32_0 = arith.constant 0 : i32
    %c0_i32_1 = arith.constant 0 : i32
    return %c0_i32, %c0_i32_0 : i32, i32
  }
  func.func @transform_4(%arg0: i32) -> (i32, i32, i32) {
    %c0_i32 = arith.constant 0 : i32
    %c0_i32_0 = arith.constant 0 : i32
    %c0_i32_1 = arith.constant 0 : i32
    return %arg0, %c0_i32, %c0_i32_0 : i32, i32, i32
  }
}

</mosaic_0001>

<bundles_post_ra>
// kernel: adaptive_gcn_pallas.1
= control target key start
LH: loop header
LB: loop body
LE: loop exit
PB: predicated region body
PF: predicated region fallthrough
CT: control target
= control target key end

     0   :  { %v5576_v3 = vmov 0.0   ;;  %vm39_vm0 = vcmask 130048   ;;  %v4273_v23 = vmov 1983009808   ;;  %v385_v25 = vlaneseq  ;;  %s5571_s0 = inlined_call_operand.vmem [shape: f32[1,16,512], index: 0, kind: input, shape index: {}]   ;;  %s5572_s1 = inlined_call_operand.vmem [shape: f32[112,16], index: 1, kind: input, shape index: {}]   ;;  %s5573_s3 = inlined_call_operand.vmem [shape: f32[32,1], index: 3, kind: input, shape index: {}]   ;;  %s5574_s2 = inlined_call_operand.vmem [shape: f32[32,28], index: 2, kind: input, shape index: {}]   ;;  %s5575_s4 = inlined_call_operand.vmem [shape: f32[1,32,2048], index: 4, kind: output, shape index: {}]  }
   0x1   :  { %v22_v0 = vld [vmem:[%s5571_s0 + $0x28] sm:$0xff]  ;;  %v24_v1 = vld [vmem:[%s5571_s0 + $0x38] sm:$0xff]  ;;  %v21_v2 = vld [vmem:[%s5571_s0 + $0x20] sm:$0xff]  ;;  %146 = vmatprep.mubr.f32.mxu0 %v5576_v3  ;;  %295 = vmatprep.mubr.f32.mxu1 %v5576_v3  ;;  %v383_v24 = vunpack.c.l.s4 %v4273_v23  ;;  %v4274_v28 = vmov 1934713408   ;;  %vm3277_vm1 = vcmask 1043456  }
   0x2   :  { %110 = vmatprep.subr.mxu0 %v22_v0  ;;  %259 = vmatprep.subr.mxu1 %v24_v1  ;;  %v23_v4 = vld [vmem:[%s5571_s0 + $0x30] sm:$0xff]  ;;  %v18_v5 = vld [vmem:[%s5571_s0 + $0x8] sm:$0xff]  ;;  %v20_v6 = vld [vmem:[%s5571_s0 + $0x18] sm:$0xff]  ;;  %v386_v27 = vshrl.u32 %v385_v25, 7  ;;  %v415_v29 = vunpack.c.l.s4 %v4274_v28  ;;  %vm3264_vm2 = vcmask 228352  }
   0x3   :  { %111 = vmatpush1.msra.mxu0 %v21_v2  ;;  %260 = vmatpush1.msra.mxu1 %v23_v4  ;;  %v17_v7 = vld [vmem:[%s5571_s0] sm:$0xff]  ;;  %v19_v8 = vld [vmem:[%s5571_s0 + $0x10] sm:$0xff]  ;;  %v26_v10 = vld [vmem:[%s5572_s1 + $0x8] sm:$0xff]  ;;  %v384_v26 = vunpack.c.0.s8 %v383_v24 }
   0x4   :  { %v25_v9 = vld [vmem:[%s5572_s1] sm:$0xff]  ;;  %112 = vmatprep.subr.mxu0 %v18_v5  ;;  %261 = vmatprep.subr.mxu1 %v20_v6  ;;  %v27_v11 = vld [vmem:[%s5572_s1 + $0x10] sm:$0xff]  ;;  %v28_v12 = vld [vmem:[%s5572_s1 + $0x18] sm:$0xff]  ;;  %v416_v33 = vunpack.c.0.s8 %v415_v29 }
   0x5   :  { %113 = vmatpush1.msra.mxu0 %v17_v7  ;;  %262 = vmatpush1.msra.mxu1 %v19_v8  ;;  %v29_v13 = vld [vmem:[%s5572_s1 + $0x20] sm:$0xff]  ;;  %v30_v14 = vld [vmem:[%s5572_s1 + $0x28] sm:$0xff]  ;;  %v31_v15 = vld [vmem:[%s5572_s1 + $0x30] sm:$0xff]  ;;  %v4425_v32 = vsub.s32 %v384_v26, %v386_v27 }
   0x6   :  { %4106 = vmatmul.mubr.msk.f32.vlgmr.msra.gmra.mxu0 %vm39_vm0, %v25_v9  ;;  %4120 = vmatmul.mubr.msk.f32.vlgmr.msra.gmra.mxu1 %vm39_vm0, %v25_v9  ;;  %v32_v16 = vld [vmem:[%s5572_s1 + $0x38] sm:$0xff]  ;;  %v33_v17 = vld [vmem:[%s5572_s1 + $0x40] sm:$0xff]  ;;  %v34_v18 = vld [vmem:[%s5572_s1 + $0x48] sm:$0xff]  ;;  %v4429_v42 = vsub.s32 %v416_v33, %v386_v27 }
   0x7   :  { %152 = vmatprep.mubr.f32.mxu0 %v5576_v3  ;;  %301 = vmatprep.mubr.f32.mxu1 %v5576_v3  ;;  %v35_v19 = vld [vmem:[%s5572_s1 + $0x50] sm:$0xff]  ;;  %v36_v20 = vld [vmem:[%s5572_s1 + $0x58] sm:$0xff]  ;;  %v37_v21 = vld [vmem:[%s5572_s1 + $0x60] sm:$0xff] }
   0x8   :  { %v38_v22 = vld [vmem:[%s5572_s1 + $0x68] sm:$0xff] }
   0xa   :  { %4107 = vmatmul.mubr.msk.f32.gmra.mxu0 %vm39_vm0, %v26_v10  ;;  %4121 = vmatmul.mubr.msk.f32.gmra.mxu1 %vm39_vm0, %v26_v10 }
   0xb   :  { %158 = vmatprep.mubr.f32.mxu0 %v5576_v3  ;;  %307 = vmatprep.mubr.f32.mxu1 %v5576_v3 }
   0xe   :  { %4108 = vmatmul.mubr.msk.f32.gmra.mxu0 %vm39_vm0, %v27_v11  ;;  %4122 = vmatmul.mubr.msk.f32.gmra.mxu1 %vm39_vm0, %v27_v11 }
   0xf   :  { %164 = vmatprep.mubr.f32.mxu0 %v5576_v3  ;;  %313 = vmatprep.mubr.f32.mxu1 %v5576_v3 }
  0x12   :  { %4109 = vmatmul.mubr.msk.f32.gmra.mxu0 %vm39_vm0, %v28_v12  ;;  %4123 = vmatmul.mubr.msk.f32.gmra.mxu1 %vm39_vm0, %v28_v12 }
  0x13   :  { %170 = vmatprep.mubr.f32.mxu0 %v5576_v3  ;;  %319 = vmatprep.mubr.f32.mxu1 %v5576_v3 }
  0x16   :  { %4110 = vmatmul.mubr.msk.f32.gmra.mxu0 %vm39_vm0, %v29_v13  ;;  %4124 = vmatmul.mubr.msk.f32.gmra.mxu1 %vm39_vm0, %v29_v13 }
  0x17   :  { %176 = vmatprep.mubr.f32.mxu0 %v5576_v3  ;;  %325 = vmatprep.mubr.f32.mxu1 %v5576_v3 }
  0x1a   :  { %4111 = vmatmul.mubr.msk.f32.gmra.mxu0 %vm39_vm0, %v30_v14  ;;  %4125 = vmatmul.mubr.msk.f32.gmra.mxu1 %vm39_vm0, %v30_v14 }
  0x1b   :  { %182 = vmatprep.mubr.f32.mxu0 %v5576_v3  ;;  %331 = vmatprep.mubr.f32.mxu1 %v5576_v3 }
  0x1e   :  { %4112 = vmatmul.mubr.msk.f32.gmra.mxu0 %vm39_vm0, %v31_v15  ;;  %4126 = vmatmul.mubr.msk.f32.gmra.mxu1 %vm39_vm0, %v31_v15 }
  0x1f   :  { %188 = vmatprep.mubr.f32.mxu0 %v5576_v3  ;;  %337 = vmatprep.mubr.f32.mxu1 %v5576_v3 }
  0x22   :  { %4113 = vmatmul.mubr.msk.f32.gmra.mxu0 %vm39_vm0, %v32_v16  ;;  %4127 = vmatmul.mubr.msk.f32.gmra.mxu1 %vm39_vm0, %v32_v16 }
  0x23   :  { %194 = vmatprep.mubr.f32.mxu0 %v5576_v3  ;;  %343 = vmatprep.mubr.f32.mxu1 %v5576_v3 }
  0x26   :  { %4114 = vmatmul.mubr.msk.f32.gmra.mxu0 %vm39_vm0, %v33_v17  ;;  %4128 = vmatmul.mubr.msk.f32.gmra.mxu1 %vm39_vm0, %v33_v17 }
  0x27   :  { %200 = vmatprep.mubr.f32.mxu0 %v5576_v3  ;;  %349 = vmatprep.mubr.f32.mxu1 %v5576_v3 }
  0x2a   :  { %4115 = vmatmul.mubr.msk.f32.gmra.mxu0 %vm39_vm0, %v34_v18  ;;  %4129 = vmatmul.mubr.msk.f32.gmra.mxu1 %vm39_vm0, %v34_v18 }
  0x2b   :  { %206 = vmatprep.mubr.f32.mxu0 %v5576_v3  ;;  %355 = vmatprep.mubr.f32.mxu1 %v5576_v3 }
  0x2e   :  { %4116 = vmatmul.mubr.msk.f32.gmra.mxu0 %vm39_vm0, %v35_v19  ;;  %4130 = vmatmul.mubr.msk.f32.gmra.mxu1 %vm39_vm0, %v35_v19 }
  0x2f   :  { %212 = vmatprep.mubr.f32.mxu0 %v5576_v3  ;;  %361 = vmatprep.mubr.f32.mxu1 %v5576_v3 }
  0x32   :  { %4117 = vmatmul.mubr.msk.f32.gmra.mxu0 %vm39_vm0, %v36_v20  ;;  %4131 = vmatmul.mubr.msk.f32.gmra.mxu1 %vm39_vm0, %v36_v20 }
  0x33   :  { %218 = vmatprep.mubr.f32.mxu0 %v5576_v3  ;;  %367 = vmatprep.mubr.f32.mxu1 %v5576_v3 }
  0x36   :  { %4118 = vmatmul.mubr.msk.f32.gmra.mxu0 %vm39_vm0, %v37_v21  ;;  %4132 = vmatmul.mubr.msk.f32.gmra.mxu1 %vm39_vm0, %v37_v21 }
  0x37   :  { %224 = vmatprep.mubr.f32.mxu0 %v5576_v3  ;;  %373 = vmatprep.mubr.f32.mxu1 %v5576_v3 }
  0x3a   :  { %4119 = vmatmul.mubr.msk.f32.gmra.mxu0 %vm39_vm0, %v38_v22  ;;  %4133 = vmatmul.mubr.msk.f32.gmra.mxu1 %vm39_vm0, %v38_v22 }
  0x3b   :  { %3390 = vmatprep.mubr.f32.mxu0 %v5576_v3  ;;  %3479 = vmatprep.mubr.f32.mxu1 %v5576_v3 }
  0xc6   :  { %v148_v30 = vpop.f32.mrf.mxu0  ;;  %v297_v31 = vpop.f32.mrf.mxu1 }
  0xc7   :  { %v380_v34 = vcombine.low %v148_v30, %v297_v31  ;;  %v381_v35 = vcombine.high %v148_v30, %v297_v31 }
  0xc8   :  { %v150_v36 = vpop.f32.mrf.mxu0  ;;  %v299_v37 = vpop.f32.mrf.mxu1 }
  0xc9   :  { %v396_v38 = vcombine.low %v150_v36, %v299_v37  ;;  %v397_v39 = vcombine.high %v150_v36, %v299_v37  ;;  %v388_v40 = vrot.slane %v380_v34, %v4425_v32  ;;  %v395_v41 = vrot.slane %v381_v35, %v4425_v32 }
  0xca   :  { %v154_v43 = vpop.f32.mrf.mxu0  ;;  %v303_v44 = vpop.f32.mrf.mxu1 }
  0xcb   :  { %v404_v45 = vrot.slane %v396_v38, %v4425_v32  ;;  %v411_v46 = vrot.slane %v397_v39, %v4425_v32  ;;  %v448_v47 = vcombine.low %v154_v43, %v303_v44  ;;  %v449_v48 = vcombine.high %v154_v43, %v303_v44 }
  0xcc   :  { %v156_v49 = vpop.f32.mrf.mxu0  ;;  %v305_v50 = vpop.f32.mrf.mxu1 }
  0xcd   :  { %v412_v51 = vcombine.low %v388_v40, %v404_v45  ;;  %v413_v52 = vcombine.high %v388_v40, %v404_v45  ;;  %v428_v53 = vcombine.low %v395_v41, %v411_v46  ;;  %v429_v54 = vcombine.high %v395_v41, %v411_v46 }
  0xce   :  { %v456_v55 = vrot.slane %v448_v47, %v4425_v32  ;;  %v463_v56 = vrot.slane %v449_v48, %v4425_v32  ;;  %v464_v57 = vcombine.low %v156_v49, %v305_v50  ;;  %v465_v58 = vcombine.high %v156_v49, %v305_v50  ;;  %v160_v59 = vpop.f32.mrf.mxu0  ;;  %v309_v60 = vpop.f32.mrf.mxu1 }
  0xcf   :  { %v420_v61 = vrot.slane %v412_v51, %v4429_v42  ;;  %v427_v62 = vrot.slane %v413_v52, %v4429_v42  ;;  %v436_v63 = vrot.slane %v428_v53, %v4429_v42  ;;  %v443_v0 = vrot.slane %v429_v54, %v4429_v42 }
  0xd0   :  { %v472_v1 = vrot.slane %v464_v57, %v4425_v32  ;;  %v479_v2 = vrot.slane %v465_v58, %v4425_v32  ;;  %v516_v4 = vcombine.low %v160_v59, %v309_v60  ;;  %v517_v5 = vcombine.high %v160_v59, %v309_v60  ;;  %v162_v6 = vpop.f32.mrf.mxu0  ;;  %v311_v7 = vpop.f32.mrf.mxu1 }
  0xd1   :  { %v1332_v8 = vcombine.low %v420_v61, %v427_v62  ;;  %v4134_v9 = vcombine.high %v420_v61, %v427_v62  ;;  %v1348_v10 = vcombine.low %v436_v63, %v443_v0  ;;  %v4135_v11 = vcombine.high %v436_v63, %v443_v0 }
  0xd2   :  { %v480_v12 = vcombine.low %v456_v55, %v472_v1  ;;  %v481_v13 = vcombine.high %v456_v55, %v472_v1  ;;  %v496_v14 = vcombine.low %v463_v56, %v479_v2  ;;  %v497_v15 = vcombine.high %v463_v56, %v479_v2  ;;  %v166_v16 = vpop.f32.mrf.mxu0  ;;  %v315_v17 = vpop.f32.mrf.mxu1 }
  0xd3   :  { %v4442_v18 = vrot.slane %v1332_v8, %v4425_v32  ;;  %v4445_v19 = vrot.slane %v4134_v9, %v4425_v32  ;;  %v4448_v20 = vrot.slane %v1348_v10, %v4425_v32  ;;  %v4451_v21 = vrot.slane %v4135_v11, %v4425_v32 }
  0xd4   :  { %v488_v22 = vrot.slane %v480_v12, %v4429_v42  ;;  %v495_v23 = vrot.slane %v481_v13, %v4429_v42  ;;  %v504_v24 = vrot.slane %v496_v14, %v4429_v42  ;;  %v511_v25 = vrot.slane %v497_v15, %v4429_v42  ;;  %v168_v26 = vpop.f32.mrf.mxu0  ;;  %v317_v27 = vpop.f32.mrf.mxu1 }
  0xd5   :  { %v524_v39 = vrot.slane %v516_v4, %v4425_v32  ;;  %v531_v40 = vrot.slane %v517_v5, %v4425_v32  ;;  %v532_v41 = vcombine.low %v162_v6, %v311_v7  ;;  %v533_v43 = vcombine.high %v162_v6, %v311_v7 }
  0xd6   :  { %v1400_v33 = vcombine.low %v488_v22, %v495_v23  ;;  %v4136_v34 = vcombine.high %v488_v22, %v495_v23  ;;  %v1416_v35 = vcombine.low %v504_v24, %v511_v25  ;;  %v4137_v36 = vcombine.high %v504_v24, %v511_v25  ;;  %v4465_v37 = vpop.f32.mrf.mxu0  ;;  %v4467_v38 = vpop.f32.mrf.mxu1 }
  0xd7   :  { %v540_v50 = vrot.slane %v532_v41, %v4425_v32  ;;  %v547_v51 = vrot.slane %v533_v43, %v4425_v32  ;;  %v584_v52 = vcombine.low %v166_v16, %v315_v17  ;;  %v585_v53 = vcombine.high %v166_v16, %v315_v17 }
  0xd8   :  { %v4472_v44 = vrot.slane %v1400_v33, %v4425_v32  ;;  %v4475_v45 = vrot.slane %v4136_v34, %v4425_v32  ;;  %v4478_v46 = vrot.slane %v1416_v35, %v4425_v32  ;;  %v4481_v47 = vrot.slane %v4137_v36, %v4425_v32  ;;  %v4483_v48 = vpop.f32.mrf.mxu0  ;;  %v4485_v49 = vpop.f32.mrf.mxu1 }
  0xd9   :  { %v548_v58 = vcombine.low %v524_v39, %v540_v50  ;;  %v549_v59 = vcombine.high %v524_v39, %v540_v50  ;;  %v564_v60 = vcombine.low %v531_v40, %v547_v51  ;;  %v565_v61 = vcombine.high %v531_v40, %v547_v51 }
  0xda   :  { %5598 = vst [vmem:[#allocation2_spill] sm:$0xff] %v4478_v46  ;;  %5599 = vst [vmem:[#allocation3_spill] sm:$0xff] %v4481_v47  ;;  %v4497_v62 = vpop.f32.mrf.mxu0  ;;  %v4499_v63 = vpop.f32.mrf.mxu1  ;;  %v592_v0 = vrot.slane %v584_v52, %v4425_v32  ;;  %v599_v1 = vrot.slane %v585_v53, %v4425_v32  ;;  %v600_v2 = vcombine.low %v168_v26, %v317_v27 }
  0xdb   :  { %v601_v4 = vcombine.high %v168_v26, %v317_v27  ;;  %v556_v5 = vrot.slane %v548_v58, %v4429_v42  ;;  %v563_v6 = vrot.slane %v549_v59, %v4429_v42  ;;  %v572_v7 = vrot.slane %v564_v60, %v4429_v42 }
  0xdc   :  { %v579_v8 = vrot.slane %v565_v61, %v4429_v42  ;;  %v608_v9 = vrot.slane %v600_v2, %v4425_v32  ;;  %v652_v11 = vcombine.low %v4465_v37, %v4467_v38  ;;  %v653_v12 = vcombine.high %v4465_v37, %v4467_v38  ;;  %v180_v17 = vpop.f32.mrf.mxu0  ;;  %v329_v22 = vpop.f32.mrf.mxu1 }
  0xdd   :  { %v615_v10 = vrot.slane %v601_v4, %v4425_v32  ;;  %v1468_v13 = vcombine.low %v556_v5, %v563_v6  ;;  %v4138_v14 = vcombine.high %v556_v5, %v563_v6  ;;  %v669_v2 = vcombine.high %v4483_v48, %v4485_v49 }
  0xde   :  { %v1484_v15 = vcombine.low %v572_v7, %v579_v8  ;;  %v4139_v16 = vcombine.high %v572_v7, %v579_v8  ;;  %v616_v23 = vcombine.low %v592_v0, %v608_v9  ;;  %v617_v24 = vcombine.high %v592_v0, %v608_v9  ;;  %v4537_v51 = vpop.f32.mrf.mxu0  ;;  %v4539_v52 = vpop.f32.mrf.mxu1 }
  0xdf   :  { %v632_v25 = vcombine.low %v599_v1, %v615_v10  ;;  %v633_v26 = vcombine.high %v599_v1, %v615_v10  ;;  %v4514_v27 = vrot.slane %v1468_v13, %v4425_v32  ;;  %v4517_v33 = vrot.slane %v4138_v14, %v4425_v32 }
  0xe0   :  { %v4520_v34 = vrot.slane %v1484_v15, %v4425_v32  ;;  %v4523_v35 = vrot.slane %v4139_v16, %v4425_v32  ;;  %v624_v36 = vrot.slane %v616_v23, %v4429_v42  ;;  %v631_v37 = vrot.slane %v617_v24, %v4429_v42 }
  0xe1   :  { %v640_v38 = vrot.slane %v632_v25, %v4429_v42  ;;  %v647_v39 = vrot.slane %v633_v26, %v4429_v42  ;;  %v660_v61 = vrot.slane %v652_v11, %v4425_v32  ;;  %v667_v0 = vrot.slane %v653_v12, %v4425_v32  ;;  %v335_v11 = vpop.f32.mrf.mxu1 }
  0xe2   :  { %v1536_v53 = vcombine.low %v624_v36, %v631_v37  ;;  %v4140_v58 = vcombine.high %v624_v36, %v631_v37  ;;  %v668_v1 = vcombine.low %v4483_v48, %v4485_v49  ;;  %v683_v9 = vrot.slane %v669_v2, %v4425_v32  ;;  %v186_v49 = vpop.f32.mrf.mxu0 }
  0xe3   :  { %v1552_v59 = vcombine.low %v640_v38, %v647_v39  ;;  %v4141_v60 = vcombine.high %v640_v38, %v647_v39  ;;  %v720_v10 = vcombine.low %v4497_v62, %v4499_v63  ;;  %v721_v48 = vcombine.high %v4497_v62, %v4499_v63 }
  0xe4   :  { %v4548_v4 = vrot.slane %v1536_v53, %v4425_v32  ;;  %v4551_v5 = vrot.slane %v4140_v58, %v4425_v32  ;;  %v676_v8 = vrot.slane %v668_v1, %v4425_v32  ;;  %v700_v24 = vcombine.low %v667_v0, %v683_v9  ;;  %v190_v58 = vpop.f32.mrf.mxu0 }
  0xe5   :  { %v4554_v6 = vrot.slane %v1552_v59, %v4425_v32  ;;  %v4557_v7 = vrot.slane %v4141_v60, %v4425_v32  ;;  %v701_v25 = vcombine.high %v667_v0, %v683_v9  ;;  %v728_v62 = vrot.slane %v720_v10, %v4425_v32  ;;  %v339_v59 = vpop.f32.mrf.mxu1 }
  0xe6   :  { %v684_v16 = vcombine.low %v660_v61, %v676_v8  ;;  %v685_v23 = vcombine.high %v660_v61, %v676_v8  ;;  %v735_v63 = vrot.slane %v721_v48, %v4425_v32  ;;  %v736_v26 = vcombine.low %v180_v17, %v329_v22 }
  0xe7   :  { %5600 = vst [vmem:[#allocation4_spill] sm:$0xff] %v4554_v6  ;;  %5601 = vst [vmem:[#allocation5_spill] sm:$0xff] %v4557_v7  ;;  %v737_v36 = vcombine.high %v180_v17, %v329_v22  ;;  %v708_v39 = vrot.slane %v700_v24, %v4429_v42  ;;  %v715_v53 = vrot.slane %v701_v25, %v4429_v42 }
  0xe8   :  { %v692_v37 = vrot.slane %v684_v16, %v4429_v42  ;;  %v699_v38 = vrot.slane %v685_v23, %v4429_v42  ;;  %v744_v60 = vrot.slane %v736_v26, %v4425_v32  ;;  %v788_v0 = vcombine.low %v4537_v51, %v4539_v52 }
  0xe9   :  { %v751_v61 = vrot.slane %v737_v36, %v4425_v32  ;;  %v789_v17 = vcombine.high %v4537_v51, %v4539_v52  ;;  %v1620_v2 = vcombine.low %v708_v39, %v715_v53  ;;  %v4143_v8 = vcombine.high %v708_v39, %v715_v53  ;;  %v192_v51 = vpop.f32.mrf.mxu0  ;;  %v341_v52 = vpop.f32.mrf.mxu1 }
  0xea   :  { %v1604_v22 = vcombine.low %v692_v37, %v699_v38  ;;  %v4142_v1 = vcombine.high %v692_v37, %v699_v38  ;;  %v752_v9 = vcombine.low %v728_v62, %v744_v60  ;;  %v753_v10 = vcombine.high %v728_v62, %v744_v60 }
  0xeb   :  { %v768_v48 = vcombine.low %v735_v63, %v751_v61  ;;  %v769_v16 = vcombine.high %v735_v63, %v751_v61  ;;  %v4592_v25 = vrot.slane %v1620_v2, %v4425_v32  ;;  %v4595_v26 = vrot.slane %v4143_v8, %v4425_v32  ;;  %v345_v15 = vpop.f32.mrf.mxu1 }
  0xec   :  { %v4586_v23 = vrot.slane %v1604_v22, %v4425_v32  ;;  %v4589_v24 = vrot.slane %v4142_v1, %v4425_v32  ;;  %v760_v36 = vrot.slane %v752_v9, %v4429_v42  ;;  %v767_v62 = vrot.slane %v753_v10, %v4429_v42 }
  0xed   :  { %v776_v63 = vrot.slane %v768_v48, %v4429_v42  ;;  %v783_v37 = vrot.slane %v769_v16, %v4429_v42  ;;  %v796_v8 = vrot.slane %v788_v0, %v4425_v32  ;;  %v803_v9 = vrot.slane %v789_v17, %v4425_v32  ;;  %v196_v16 = vpop.f32.mrf.mxu0 }
  0xee   :  { %v1672_v61 = vcombine.low %v760_v36, %v767_v62  ;;  %v4144_v22 = vcombine.high %v760_v36, %v767_v62  ;;  %v804_v10 = vcombine.low %v186_v49, %v335_v11  ;;  %v805_v48 = vcombine.high %v186_v49, %v335_v11 }
  0xef   :  { %v1688_v1 = vcombine.low %v776_v63, %v783_v37  ;;  %v4145_v2 = vcombine.high %v776_v63, %v783_v37  ;;  %v856_v62 = vcombine.low %v190_v58, %v339_v59  ;;  %v857_v49 = vcombine.high %v190_v58, %v339_v59  ;;  %v198_v13 = vpop.f32.mrf.mxu0 }
  0xf0   :  { %v4612_v14 = vrot.slane %v1672_v61, %v4425_v32  ;;  %v4615_v57 = vrot.slane %v4144_v22, %v4425_v32  ;;  %v812_v0 = vrot.slane %v804_v10, %v4425_v32  ;;  %v819_v17 = vrot.slane %v805_v48, %v4425_v32  ;;  %v347_v48 = vpop.f32.mrf.mxu1 }
  0xf1   :  { %v4618_v56 = vrot.slane %v1688_v1, %v4425_v32  ;;  %v4621_v36 = vrot.slane %v4145_v2, %v4425_v32  ;;  %v864_v58 = vrot.slane %v856_v62, %v4425_v32  ;;  %v871_v59 = vrot.slane %v857_v49, %v4425_v32  ;;  %v202_v43 = vpop.f32.mrf.mxu0 }
  0xf2   :  { %v820_v22 = vcombine.low %v796_v8, %v812_v0  ;;  %v821_v1 = vcombine.high %v796_v8, %v812_v0  ;;  %v836_v2 = vcombine.low %v803_v9, %v819_v17  ;;  %v837_v10 = vcombine.high %v803_v9, %v819_v17 }
  0xf3   :  { %5602 = vst [vmem:[#allocation6_spill] sm:$0xff] %v4618_v56  ;;  %5603 = vst [vmem:[#allocation7_spill] sm:$0xff] %v4621_v36  ;;  %v872_v12 = vcombine.low %v192_v51, %v341_v52  ;;  %v873_v55 = vcombine.high %v192_v51, %v341_v52  ;;  %v924_v0 = vcombine.low %v196_v16, %v345_v15  ;;  %v351_v51 = vpop.f32.mrf.mxu1 }
  0xf4   :  { %v828_v54 = vrot.slane %v820_v22, %v4429_v42  ;;  %v835_v63 = vrot.slane %v821_v1, %v4429_v42  ;;  %v844_v37 = vrot.slane %v836_v2, %v4429_v42  ;;  %v851_v61 = vrot.slane %v837_v10, %v4429_v42 }
  0xf5   :  { %v880_v8 = vrot.slane %v872_v12, %v4425_v32  ;;  %v887_v9 = vrot.slane %v873_v55, %v4425_v32  ;;  %v925_v17 = vcombine.high %v196_v16, %v345_v15 }
  0xf6   :  { %v1740_v11 = vcombine.low %v828_v54, %v835_v63  ;;  %v4146_v62 = vcombine.high %v828_v54, %v835_v63  ;;  %v1756_v50 = vcombine.low %v844_v37, %v851_v61  ;;  %v4147_v49 = vcombine.high %v844_v37, %v851_v61 }
  0xf7   :  { %v888_v52 = vcombine.low %v864_v58, %v880_v8  ;;  %v889_v22 = vcombine.high %v864_v58, %v880_v8  ;;  %v904_v31 = vcombine.low %v871_v59, %v887_v9  ;;  %v905_v1 = vcombine.high %v871_v59, %v887_v9  ;;  %v204_v58 = vpop.f32.mrf.mxu0  ;;  %v353_v59 = vpop.f32.mrf.mxu1 }
  0xf8   :  { %v4642_v2 = vrot.slane %v1740_v11, %v4425_v32  ;;  %v4645_v10 = vrot.slane %v4146_v62, %v4425_v32  ;;  %v4648_v55 = vrot.slane %v1756_v50, %v4425_v32  ;;  %v4651_v12 = vrot.slane %v4147_v49, %v4425_v32 }
  0xf9   :  { %v896_v54 = vrot.slane %v888_v52, %v4429_v42  ;;  %v903_v15 = vrot.slane %v889_v22, %v4429_v42  ;;  %v912_v16 = vrot.slane %v904_v31, %v4429_v42  ;;  %v919_v63 = vrot.slane %v905_v1, %v4429_v42 }
  0xfa   :  { %v932_v49 = vrot.slane %v924_v0, %v4425_v32  ;;  %v939_v52 = vrot.slane %v925_v17, %v4425_v32  ;;  %v940_v22 = vcombine.low %v198_v13, %v347_v48  ;;  %v941_v1 = vcombine.high %v198_v13, %v347_v48  ;;  %v357_v13 = vpop.f32.mrf.mxu1 }
  0xfb   :  { %v1808_v8 = vcombine.low %v896_v54, %v903_v15  ;;  %v4148_v9 = vcombine.high %v896_v54, %v903_v15  ;;  %v1824_v62 = vcombine.low %v912_v16, %v919_v63  ;;  %v4149_v31 = vcombine.high %v912_v16, %v919_v63  ;;  %v208_v16 = vpop.f32.mrf.mxu0 }
  0xfc   :  { %v948_v54 = vrot.slane %v940_v22, %v4425_v32  ;;  %v955_v0 = vrot.slane %v941_v1, %v4425_v32  ;;  %v992_v15 = vcombine.low %v202_v43, %v351_v51  ;;  %v993_v17 = vcombine.high %v202_v43, %v351_v51 }
  0xfd   :  { %v4668_v30 = vrot.slane %v1808_v8, %v4425_v32  ;;  %v4671_v50 = vrot.slane %v4148_v9, %v4425_v32  ;;  %v4674_v61 = vrot.slane %v1824_v62, %v4425_v32  ;;  %v4677_v60 = vrot.slane %v4149_v31, %v4425_v32  ;;  %v210_v29 = vpop.f32.mrf.mxu0  ;;  %v359_v9 = vpop.f32.mrf.mxu1 }
  0xfe   :  { %v956_v62 = vcombine.low %v932_v49, %v948_v54  ;;  %v957_v31 = vcombine.high %v932_v49, %v948_v54  ;;  %v972_v22 = vcombine.low %v939_v52, %v955_v0  ;;  %v973_v1 = vcombine.high %v939_v52, %v955_v0 }
  0xff   :  { %5604 = vst [vmem:[#allocation8_spill] sm:$0xff] %v4674_v61  ;;  %5605 = vst [vmem:[#allocation9_spill] sm:$0xff] %v4677_v60  ;;  %v1000_v43 = vrot.slane %v992_v15, %v4425_v32  ;;  %v1007_v51 = vrot.slane %v993_v17, %v4425_v32  ;;  %v1008_v53 = vcombine.low %v204_v58, %v353_v59 }
 0x100   :  { %v1009_v41 = vcombine.high %v204_v58, %v353_v59  ;;  %v964_v48 = vrot.slane %v956_v62, %v4429_v42  ;;  %v971_v63 = vrot.slane %v957_v31, %v4429_v42  ;;  %v980_v40 = vrot.slane %v972_v22, %v4429_v42 }
 0x101   :  { %v987_v8 = vrot.slane %v973_v1, %v4429_v42  ;;  %v1016_v49 = vrot.slane %v1008_v53, %v4425_v32  ;;  %v1060_v54 = vcombine.low %v208_v16, %v357_v13  ;;  %v1061_v0 = vcombine.high %v208_v16, %v357_v13  ;;  %v214_v16 = vpop.f32.mrf.mxu0  ;;  %v363_v13 = vpop.f32.mrf.mxu1 }
 0x102   :  { %v1023_v52 = vrot.slane %v1009_v41, %v4425_v32  ;;  %v1876_v15 = vcombine.low %v964_v48, %v971_v63  ;;  %v4150_v17 = vcombine.high %v964_v48, %v971_v63 }
 0x103   :  { %v1892_v28 = vcombine.low %v980_v40, %v987_v8  ;;  %v4151_v58 = vcombine.high %v980_v40, %v987_v8  ;;  %v1024_v59 = vcombine.low %v1000_v43, %v1016_v49  ;;  %v1025_v62 = vcombine.high %v1000_v43, %v1016_v49  ;;  %v216_v37 = vpop.f32.mrf.mxu0  ;;  %v365_v11 = vpop.f32.mrf.mxu1 }
 0x104   :  { %v1040_v3 = vcombine.low %v1007_v51, %v1023_v52  ;;  %v1041_v31 = vcombine.high %v1007_v51, %v1023_v52  ;;  %v4698_v22 = vrot.slane %v1876_v15, %v4425_v32  ;;  %v4701_v1 = vrot.slane %v4150_v17, %v4425_v32 }
 0x105   :  { %v4704_v53 = vrot.slane %v1892_v28, %v4425_v32  ;;  %v4707_v41 = vrot.slane %v4151_v58, %v4425_v32  ;;  %v1032_v40 = vrot.slane %v1024_v59, %v4429_v42  ;;  %v1039_v48 = vrot.slane %v1025_v62, %v4429_v42  ;;  %v220_v38 = vpop.f32.mrf.mxu0 }
 0x106   :  { %v1048_v63 = vrot.slane %v1040_v3, %v4429_v42  ;;  %v1055_v8 = vrot.slane %v1041_v31, %v4429_v42  ;;  %v1068_v3 = vrot.slane %v1060_v54, %v4425_v32  ;;  %v1075_v59 = vrot.slane %v1061_v0, %v4425_v32 }
 0x107   :  { %v1944_v52 = vcombine.low %v1032_v40, %v1039_v48  ;;  %v4152_v15 = vcombine.high %v1032_v40, %v1039_v48  ;;  %v1076_v62 = vcombine.low %v210_v29, %v359_v9  ;;  %v1077_v31 = vcombine.high %v210_v29, %v359_v9 }
 0x108   :  { %v1960_v17 = vcombine.low %v1048_v63, %v1055_v8  ;;  %v4153_v58 = vcombine.high %v1048_v63, %v1055_v8  ;;  %v1128_v48 = vcombine.low %v214_v16, %v363_v13  ;;  %v1129_v29 = vcombine.high %v214_v16, %v363_v13 }
 0x109   :  { %v4724_v39 = vrot.slane %v1944_v52, %v4425_v32  ;;  %v4727_v51 = vrot.slane %v4152_v15, %v4425_v32  ;;  %v1084_v54 = vrot.slane %v1076_v62, %v4425_v32  ;;  %v1091_v0 = vrot.slane %v1077_v31, %v4425_v32  ;;  %v369_v31 = vpop.f32.mrf.mxu1 }
 0x10a   :  { %v4730_v49 = vrot.slane %v1960_v17, %v4425_v32  ;;  %v4733_v40 = vrot.slane %v4153_v58, %v4425_v32  ;;  %v1136_v16 = vrot.slane %v1128_v48, %v4425_v32  ;;  %v1143_v13 = vrot.slane %v1129_v29, %v4425_v32 }
 0x10b   :  { %v1092_v15 = vcombine.low %v1068_v3, %v1084_v54  ;;  %v1093_v17 = vcombine.high %v1068_v3, %v1084_v54  ;;  %v1108_v58 = vcombine.low %v1075_v59, %v1091_v0  ;;  %v1109_v62 = vcombine.high %v1075_v59, %v1091_v0 }
 0x10c   :  { %v1144_v9 = vcombine.low %v216_v37, %v365_v11  ;;  %v1145_v28 = vcombine.high %v216_v37, %v365_v11  ;;  %v1196_v54 = vcombine.low %v220_v38, %v369_v31  ;;  %v1197_v0 = vcombine.high %v220_v38, %v369_v31  ;;  %v222_v38 = vpop.f32.mrf.mxu0 }
 0x10d   :  { %v1100_v63 = vrot.slane %v1092_v15, %v4429_v42  ;;  %v1107_v43 = vrot.slane %v1093_v17, %v4429_v42  ;;  %v1116_v8 = vrot.slane %v1108_v58, %v4429_v42  ;;  %v1123_v52 = vrot.slane %v1109_v62, %v4429_v42 }
 0x10e   :  { %v1152_v3 = vrot.slane %v1144_v9, %v4425_v32  ;;  %v1159_v59 = vrot.slane %v1145_v28, %v4425_v32 }
 0x10f   :  { %v2012_v7 = vcombine.low %v1100_v63, %v1107_v43  ;;  %v4154_v48 = vcombine.high %v1100_v63, %v1107_v43  ;;  %v2028_v6 = vcombine.low %v1116_v8, %v1123_v52  ;;  %v4155_v29 = vcombine.high %v1116_v8, %v1123_v52  ;;  %v371_v43 = vpop.f32.mrf.mxu1 }
 0x110   :  { %v1160_v47 = vcombine.low %v1136_v16, %v1152_v3  ;;  %v1161_v11 = vcombine.high %v1136_v16, %v1152_v3  ;;  %v1176_v37 = vcombine.low %v1143_v13, %v1159_v59  ;;  %v1177_v15 = vcombine.high %v1143_v13, %v1159_v59  ;;  %v226_v13 = vpop.f32.mrf.mxu0 }
 0x111   :  { %v4754_v17 = vrot.slane %v2012_v7, %v4425_v32  ;;  %v4757_v58 = vrot.slane %v4154_v48, %v4425_v32  ;;  %v4760_v9 = vrot.slane %v2028_v6, %v4425_v32  ;;  %v4763_v28 = vrot.slane %v4155_v29, %v4425_v32 }
 0x112   :  { %v1168_v63 = vrot.slane %v1160_v47, %v4429_v42  ;;  %v1175_v8 = vrot.slane %v1161_v11, %v4429_v42  ;;  %v1184_v52 = vrot.slane %v1176_v37, %v4429_v42  ;;  %v1191_v7 = vrot.slane %v1177_v15, %v4429_v42  ;;  %v375_v47 = vpop.f32.mrf.mxu1 }
 0x113   :  { %v1204_v11 = vrot.slane %v1196_v54, %v4425_v32  ;;  %v1211_v37 = vrot.slane %v1197_v0, %v4425_v32  ;;  %v1212_v15 = vcombine.low %v222_v38, %v371_v43  ;;  %v1213_v62 = vcombine.high %v222_v38, %v371_v43 }
 0x114   :  { %v2080_v3 = vcombine.low %v1168_v63, %v1175_v8  ;;  %v4156_v59 = vcombine.high %v1168_v63, %v1175_v8  ;;  %v2096_v48 = vcombine.low %v1184_v52, %v1191_v7  ;;  %v4157_v29 = vcombine.high %v1184_v52, %v1191_v7  ;;  %v228_v52 = vpop.f32.mrf.mxu0  ;;  %v377_v38 = vpop.f32.mrf.mxu1 }
 0x115   :  { %v1220_v63 = vrot.slane %v1212_v15, %v4425_v32  ;;  %v1227_v54 = vrot.slane %v1213_v62, %v4425_v32  ;;  %v1264_v8 = vcombine.low %v226_v13, %v375_v47  ;;  %v1265_v0 = vcombine.high %v226_v13, %v375_v47 }
 0x116   :  { %v4780_v6 = vrot.slane %v2080_v3, %v4425_v32  ;;  %v4783_v31 = vrot.slane %v4156_v59, %v4425_v32  ;;  %v4786_v16 = vrot.slane %v2096_v48, %v4425_v32  ;;  %v4789_v46 = vrot.slane %v4157_v29, %v4425_v32 }
 0x117   :  { %v1228_v48 = vcombine.low %v1204_v11, %v1220_v63  ;;  %v1229_v29 = vcombine.high %v1204_v11, %v1220_v63  ;;  %v1244_v15 = vcombine.low %v1211_v37, %v1227_v54  ;;  %v1245_v62 = vcombine.high %v1211_v37, %v1227_v54 }
 0x118   :  { %5606 = vst [vmem:[#allocation10_spill] sm:$0xff] %v4786_v16  ;;  %5607 = vst [vmem:[#allocation11_spill] sm:$0xff] %v4789_v46  ;;  %v1272_v13 = vrot.slane %v1264_v8, %v4425_v32  ;;  %v1279_v47 = vrot.slane %v1265_v0, %v4425_v32  ;;  %v1280_v60 = vcombine.low %v228_v52, %v377_v38 }
 0x119   :  { %v1281_v61 = vcombine.high %v228_v52, %v377_v38  ;;  %v1236_v43 = vrot.slane %v1228_v48, %v4429_v42  ;;  %v1243_v7 = vrot.slane %v1229_v29, %v4429_v42  ;;  %v1252_v36 = vrot.slane %v1244_v15, %v4429_v42 }
 0x11a   :  { %v1259_v3 = vrot.slane %v1245_v62, %v4429_v42  ;;  %v1288_v59 = vrot.slane %v1280_v60, %v4425_v32  ;;  %v5608_v37 = vcombine.low %v4698_v22, %v4701_v1  ;;  %v5609_v54 = vcombine.high %v4698_v22, %v4701_v1 }
 0x11b   :  { %v1295_v11 = vrot.slane %v1281_v61, %v4425_v32  ;;  %v2148_v0 = vcombine.low %v1236_v43, %v1243_v7  ;;  %v4158_v52 = vcombine.high %v1236_v43, %v1243_v7 }
 0x11c   :  { %v1916_v63 = vrot.slane %v5608_v37, %v4429_v42  ;;  %v1923_v8 = vrot.slane %v5609_v54, %v4429_v42  ;;  %v2164_v38 = vcombine.low %v1252_v36, %v1259_v3  ;;  %v4159_v48 = vcombine.high %v1252_v36, %v1259_v3 }
 0x11d   :  { %v1296_v29 = vcombine.low %v1272_v13, %v1288_v59  ;;  %v1297_v15 = vcombine.high %v1272_v13, %v1288_v59  ;;  %v1312_v62 = vcombine.low %v1279_v47, %v1295_v11  ;;  %v1313_v60 = vcombine.high %v1279_v47, %v1295_v11 }
 0x11e   :  { %v2155_v61 = vrot.slane %v2148_v0, %v4425_v32  ;;  %v2163_v56 = vrot.slane %v4158_v52, %v4425_v32  ;;  %v2171_v46 = vrot.slane %v2164_v38, %v4425_v32  ;;  %v2179_v37 = vrot.slane %v4159_v48, %v4425_v32 }
 0x11f   :  { %v1304_v16 = vrot.slane %v1296_v29, %v4429_v42  ;;  %v1311_v22 = vrot.slane %v1297_v15, %v4429_v42  ;;  %v1320_v1 = vrot.slane %v1312_v62, %v4429_v42  ;;  %v1327_v36 = vrot.slane %v1313_v60, %v4429_v42 }
 0x120   :  { %v2180_v43 = vcombine.low %v2155_v61, %v2163_v56  ;;  %v2181_v7 = vcombine.high %v2155_v61, %v2163_v56  ;;  %v2196_v3 = vcombine.low %v2171_v46, %v2179_v37  ;;  %v2197_v59 = vcombine.high %v2171_v46, %v2179_v37 }
 0x121   :  { %v2216_v13 = vcombine.low %v1304_v16, %v1311_v22  ;;  %v4160_v47 = vcombine.high %v1304_v16, %v1311_v22  ;;  %v2232_v11 = vcombine.low %v1320_v1, %v1327_v36  ;;  %v4161_v54 = vcombine.high %v1320_v1, %v1327_v36 }
 0x122   :  { %v2188_v0 = vrot.slane %v2180_v43, %v4429_v42  ;;  %v2195_v52 = vrot.slane %v2181_v7, %v4429_v42  ;;  %v4828_v38 = vrot.slane %v2196_v3, %v4429_v42  ;;  %v4831_v48 = vrot.slane %v2197_v59, %v4429_v42 }
 0x123   :  { %v2223_v29 = vrot.slane %v2216_v13, %v4425_v32  ;;  %v2231_v56 = vrot.slane %v4160_v47, %v4425_v32  ;;  %v2239_v46 = vrot.slane %v2232_v11, %v4425_v32  ;;  %v2247_v16 = vrot.slane %v4161_v54, %v4425_v32 }
 0x124   :  { %v4186_v15 = vcombine.low %v2188_v0, %v2195_v52  ;;  %v4188_v62 = vcombine.high %v2188_v0, %v2195_v52  ;;  %v5610_v60 = vcombine.low %v4754_v17, %v4757_v58  ;;  %v5611_v37 = vcombine.high %v4754_v17, %v4757_v58 }
 0x125   :  { %v2248_v1 = vcombine.low %v2223_v29, %v2231_v56  ;;  %v2249_v36 = vcombine.high %v2223_v29, %v2231_v56  ;;  %v2264_v43 = vcombine.low %v2239_v46, %v2247_v16  ;;  %v2265_v7 = vcombine.high %v2239_v46, %v2247_v16 }
 0x126   :  { %v2052_v61 = vrot.slane %v5610_v60, %v4429_v42  ;;  %v2059_v22 = vrot.slane %v5611_v37, %v4429_v42  ;;  %v2700_v3 = vrot.slane %v4186_v15, %v4425_v32  ;;  %v2716_v59 = vrot.slane %v4188_v62, %v4425_v32 }
 0x127   :  { %v4178_v13 = vcombine.low %v1916_v63, %v1923_v8  ;;  %v4180_v47 = vcombine.high %v1916_v63, %v1923_v8  ;;  %v4848_v11 = vrot.slane %v2248_v1, %v4429_v42  ;;  %v4851_v54 = vrot.slane %v2249_v36, %v4429_v42 }
 0x128   :  { %v4854_v0 = vrot.slane %v2264_v43, %v4429_v42  ;;  %v4857_v17 = vrot.slane %v2265_v7, %v4429_v42  ;;  %v2724_v58 = vcombine.low %v2700_v3, %v2716_v59  ;;  %v2725_v52 = vcombine.high %v2700_v3, %v2716_v59 }
 0x129   :  { %v2564_v29 = vrot.slane %v4178_v13, %v4425_v32  ;;  %v2580_v56 = vrot.slane %v4180_v47, %v4425_v32  ;;  %v4182_v46 = vcombine.low %v2052_v61, %v2059_v22  ;;  %v4184_v63 = vcombine.high %v2052_v61, %v2059_v22 }
 0x12a   :  { %v5612_v8 = vcombine.low %v4586_v23, %v4589_v24  ;;  %v5613_v15 = vcombine.high %v4586_v23, %v4589_v24  ;;  %v2732_v60 = vrot.slane %v2724_v58, %v4429_v42  ;;  %v2739_v37 = vrot.slane %v2725_v52, %v4429_v42 }
 0x12b   :  { %v2620_v1 = vcombine.low %v2564_v29, %v2580_v56  ;;  %v2621_v36 = vcombine.high %v2564_v29, %v2580_v56  ;;  %v2596_v43 = vrot.slane %v4182_v46, %v4425_v32  ;;  %v2612_v61 = vrot.slane %v4184_v63, %v4425_v32 }
 0x12c   :  { %v1644_v16 = vrot.slane %v5612_v8, %v4429_v42  ;;  %v1651_v62 = vrot.slane %v5613_v15, %v4429_v42  ;;  %v5614_v22 = vcombine.low %v4642_v2, %v4645_v10  ;;  %v5615_v23 = vcombine.high %v4642_v2, %v4645_v10  ;;  %v3240_v15 = vld [vmem:[%s5573_s3] sm:$0xff] }
 0x12d   :  { %v5616_v3 = vmov 0.0   ;;  %v2628_v47 = vrot.slane %v2620_v1, %v4429_v42  ;;  %v2635_v58 = vrot.slane %v2621_v36, %v4429_v42  ;;  %v2652_v52 = vcombine.low %v2596_v43, %v2612_v61 }
 0x12e   :  { %v1780_v7 = vrot.slane %v5614_v22, %v4429_v42  ;;  %v1787_v24 = vrot.slane %v5615_v23, %v4429_v42  ;;  %v2756_v59 = vcombine.high %v2732_v60, %v5616_v3  ;;  %v2757_v13 = vcombine.high %v2739_v37, %v5616_v3 }
 0x12f   :  { %v2653_v29 = vcombine.high %v2596_v43, %v2612_v61  ;;  %v4170_v56 = vcombine.low %v1644_v16, %v1651_v62  ;;  %v4172_v46 = vcombine.high %v1644_v16, %v1651_v62  ;;  %v5617_v2 = vcombine.low %v4442_v18, %v4445_v19 }
 0x130   :  { %4218 = vmatprep.subr.msk.mxu0 %vm3277_vm1, %v2756_v59  ;;  %4224 = vmatprep.subr.msk.mxu1 %vm3277_vm1, %v2757_v13  ;;  %v4174_v63 = vcombine.low %v1780_v7, %v1787_v24  ;;  %v4176_v8 = vcombine.high %v1780_v7, %v1787_v24  ;;  %v2660_v16 = vrot.slane %v2652_v52, %v4429_v42 }
 0x131   :  { %v1372_v10 = vrot.slane %v5617_v2, %v4429_v42  ;;  %4219 = vmatpush1.msk.msra.mxu0 %vm3277_vm1, %v2732_v60  ;;  %4225 = vmatpush1.msk.msra.mxu1 %vm3277_vm1, %v2739_v37  ;;  %v2667_v62 = vrot.slane %v2653_v29, %v4429_v42  ;;  %v2428_v1 = vrot.slane %v4170_v56, %v4425_v32  ;;  %v4275_v60 = vmov 0  }
 0x132   :  { %v2444_v36 = vrot.slane %v4172_v46, %v4425_v32  ;;  %v2460_v43 = vrot.slane %v4174_v63, %v4425_v32  ;;  %v2476_v61 = vrot.slane %v4176_v8, %v4425_v32  ;;  %v5618_v22 = vcombine.high %v4442_v18, %v4445_v19  ;;  %4270 = vset.pattern.permute.xlu0 %v4275_v60  ;;  %v3241_v46 = vld [vmem:[%s5573_s3 + $0x8] sm:$0xff]  ;;  %v3242_v8 = vld [vmem:[%s5573_s3 + $0x10] sm:$0xff] }
 0x133   :  { %v2685_v37 = vcombine.high %v2628_v47, %v2660_v16  ;;  %v2687_v23 = vcombine.high %v2635_v58, %v2667_v62  ;;  %v2684_v24 = vcombine.low %v2628_v47, %v2660_v16  ;;  %v2686_v59 = vcombine.low %v2635_v58, %v2667_v62  ;;  %3246 = vperm.xlu0 %4270, %v3240_v15  }
 0x134   :  { %v1379_v7 = vrot.slane %v5618_v22, %v4429_v42  ;;  %v2484_v13 = vcombine.low %v2428_v1, %v2444_v36  ;;  %v2516_v52 = vcombine.low %v2460_v43, %v2476_v61  ;;  %v2485_v29 = vcombine.high %v2428_v1, %v2444_v36  ;;  %4271 = vset.pattern.permute.xlu1 %v4275_v60 }
 0x135   :  { %v2517_v56 = vcombine.high %v2460_v43, %v2476_v61  ;;  %3352 = vmatprep.subr.mxu0 %v2685_v37  ;;  %3441 = vmatprep.subr.mxu1 %v2687_v23  ;;  %v5619_v18 = vcombine.low %v4514_v27, %v4517_v33  ;;  %v5620_v47 = vcombine.high %v4514_v27, %v4517_v33 }
 0x136   :  { %v4162_v63 = vcombine.low %v1372_v10, %v1379_v7  ;;  %3353 = vmatpush1.msra.mxu0 %v2684_v24  ;;  %3442 = vmatpush1.msra.mxu1 %v2686_v59  ;;  %v2492_v2 = vrot.slane %v2484_v13, %v4429_v42  ;;  %v2524_v15 = vrot.slane %v2516_v52, %v4429_v42 }
 0x137   :  { %v1508_v19 = vrot.slane %v5619_v18, %v4429_v42  ;;  %v1515_v58 = vrot.slane %v5620_v47, %v4429_v42  ;;  %v2499_v16 = vrot.slane %v2485_v29, %v4429_v42  ;;  %v2531_v62 = vrot.slane %v2517_v56, %v4429_v42  ;;  %3251 = vperm.xlu0 %4270, %v3241_v46   ;;  %v3243_v29 = vld [vmem:[%s5573_s3 + $0x18] sm:$0xff] }
 0x138   :  { %v2292_v1 = vrot.slane %v4162_v63, %v4425_v32  ;;  %v4164_v36 = vcombine.high %v1372_v10, %v1379_v7  ;;  %v2549_v33 = vcombine.high %v2492_v2, %v2524_v15  ;;  %v2548_v43 = vcombine.low %v2492_v2, %v2524_v15  ;;  %3256 = vperm.xlu1 %4271, %v3242_v8  }
 0x139   :  { %v4166_v27 = vcombine.low %v1508_v19, %v1515_v58  ;;  %v4168_v61 = vcombine.high %v1508_v19, %v1515_v58  ;;  %v4187_v22 = vcombine.low %v4828_v38, %v4831_v48  ;;  %v2551_v60 = vcombine.high %v2499_v16, %v2531_v62 }
 0x13a   :  { %v2550_v37 = vcombine.low %v2499_v16, %v2531_v62  ;;  %v2308_v23 = vrot.slane %v4164_v36, %v4425_v32  ;;  %3354 = vmatprep.subr.mxu0 %v2549_v33  ;;  %v4189_v7 = vcombine.high %v4828_v38, %v4831_v48  ;;  %v5621_v13 = vcombine.low %v4704_v53, %v4707_v41 }
 0x13b   :  { %v2324_v24 = vrot.slane %v4166_v27, %v4425_v32  ;;  %v2340_v59 = vrot.slane %v4168_v61, %v4425_v32  ;;  %v2707_v10 = vrot.slane %v4187_v22, %v4425_v32  ;;  %3443 = vmatprep.subr.mxu1 %v2551_v60  ;;  %3355 = vmatpush1.msra.mxu0 %v2548_v43 }
 0x13c   :  { %v1932_v52 = vrot.slane %v5621_v13, %v4429_v42  ;;  %v2348_v56 = vcombine.low %v2292_v1, %v2308_v23  ;;  %v2349_v46 = vcombine.high %v2292_v1, %v2308_v23  ;;  %v5622_v18 = vcombine.high %v4704_v53, %v4707_v41  ;;  %3444 = vmatpush1.msra.mxu1 %v2550_v37 }
 0x13d   :  { %v2380_v38 = vcombine.low %v2324_v24, %v2340_v59  ;;  %v2381_v48 = vcombine.high %v2324_v24, %v2340_v59  ;;  %v2723_v47 = vrot.slane %v4189_v7, %v4425_v32  ;;  %v5623_v58 = vcombine.low %v4760_v9, %v4763_v28  ;;  %3261 = vperm.xlu1 %4271, %v3243_v29  }
 0x13e   :  { %v1939_v19 = vrot.slane %v5622_v18, %v4429_v42  ;;  %v2356_v8 = vrot.slane %v2348_v56, %v4429_v42  ;;  %v2363_v2 = vrot.slane %v2349_v46, %v4429_v42  ;;  %v5624_v15 = vcombine.high %v4760_v9, %v4763_v28  ;;  %v4961_v9 = vld [vmem:[%s5574_s2] sm:$0xff] }
 0x13f   :  { %v2068_v63 = vrot.slane %v5623_v58, %v4429_v42  ;;  %v2388_v16 = vrot.slane %v2380_v38, %v4429_v42  ;;  %v2395_v62 = vrot.slane %v2381_v48, %v4429_v42  ;;  %v2740_v1 = vcombine.low %v2707_v10, %v2723_v47 }
 0x140   :  { %v2075_v53 = vrot.slane %v5624_v15, %v4429_v42  ;;  %v4179_v41 = vcombine.low %v1932_v52, %v1939_v19  ;;  %v2741_v36 = vcombine.high %v2707_v10, %v2723_v47  ;;  %v4181_v33 = vcombine.high %v1932_v52, %v1939_v19 }
 0x141   :  { %v2413_v22 = vcombine.high %v2356_v8, %v2388_v16  ;;  %v2415_v60 = vcombine.high %v2363_v2, %v2395_v62  ;;  %v2412_v37 = vcombine.low %v2356_v8, %v2388_v16  ;;  %v2414_v23 = vcombine.low %v2363_v2, %v2395_v62 }
 0x142   :  { %v2571_v27 = vrot.slane %v4179_v41, %v4425_v32  ;;  %v4183_v43 = vcombine.low %v2068_v63, %v2075_v53  ;;  %v4185_v61 = vcombine.high %v2068_v63, %v2075_v53  ;;  %v2748_v28 = vrot.slane %v2740_v1, %v4429_v42 }
 0x143   :  { %v2755_v24 = vrot.slane %v2741_v36, %v4429_v42  ;;  %v2587_v59 = vrot.slane %v4181_v33, %v4425_v32  ;;  %3356 = vmatprep.subr.mxu0 %v2413_v22  ;;  %3445 = vmatprep.subr.mxu1 %v2415_v60  ;;  %v5625_v13 = vcombine.low %v4592_v25, %v4595_v26 }
 0x144   :  { %v2603_v10 = vrot.slane %v4183_v43, %v4425_v32  ;;  %v2619_v7 = vrot.slane %v4185_v61, %v4425_v32  ;;  %v5626_v29 = vcombine.high %v4592_v25, %v4595_v26  ;;  %3357 = vmatpush1.msra.mxu0 %v2412_v37  ;;  %3446 = vmatpush1.msra.mxu1 %v2414_v23  ;;  %v4988_v26 = vld [vmem:[%s5574_s2 + $0x8] sm:$0xff] }
 0x145   :  { %v1660_v52 = vrot.slane %v5625_v13, %v4429_v42  ;;  %v2758_v46 = vcombine.high %v2748_v28, %v5616_v3  ;;  %v2759_v18 = vcombine.high %v2755_v24, %v5616_v3  ;;  %v2636_v19 = vcombine.low %v2571_v27, %v2587_v59  ;;  %4220 = vmatmul.mubr.msk.f32.vlgmr.msra.gmra.mxu0 %vm3264_vm2, %v4961_v9 }
 0x146   :  { %v1667_v56 = vrot.slane %v5626_v29, %v4429_v42  ;;  %4226 = vmatmul.mubr.msk.f32.vlgmr.msra.gmra.mxu1 %vm3264_vm2, %v4961_v9  ;;  %v2668_v38 = vcombine.low %v2603_v10, %v2619_v7  ;;  %v2637_v48 = vcombine.high %v2571_v27, %v2587_v59  ;;  %v2669_v47 = vcombine.high %v2603_v10, %v2619_v7  ;;  %v5027_v10 = vld [vmem:[%s5574_s2 + $0x10] sm:$0xff] }
 0x147   :  { %4230 = vmatprep.subr.msk.mxu0 %vm3277_vm1, %v2758_v46  ;;  %4236 = vmatprep.subr.msk.mxu1 %vm3277_vm1, %v2759_v18  ;;  %v2644_v25 = vrot.slane %v2636_v19, %v4429_v42  ;;  %v5627_v58 = vcombine.low %v4648_v55, %v4651_v12  ;;  %v5628_v8 = vcombine.high %v4648_v55, %v4651_v12 }
 0x148   :  { %4231 = vmatpush1.msk.msra.mxu0 %vm3277_vm1, %v2748_v28  ;;  %4237 = vmatpush1.msk.msra.mxu1 %vm3277_vm1, %v2755_v24  ;;  %v2676_v15 = vrot.slane %v2668_v38, %v4429_v42  ;;  %v2651_v53 = vrot.slane %v2637_v48, %v4429_v42  ;;  %v2683_v41 = vrot.slane %v2669_v47, %v4429_v42 }
 0x149   :  { %v1796_v63 = vrot.slane %v5627_v58, %v4429_v42  ;;  %v1803_v2 = vrot.slane %v5628_v8, %v4429_v42  ;;  %3396 = vmatprep.mubr.f32.mxu0 %v5616_v3  ;;  %3485 = vmatprep.mubr.f32.mxu1 %v5616_v3  ;;  %v4171_v16 = vcombine.low %v1660_v52, %v1667_v56 }
 0x14a   :  { %v4173_v62 = vcombine.high %v1660_v52, %v1667_v56  ;;  %v2689_v36 = vcombine.high %v2644_v25, %v2676_v15  ;;  %v2691_v55 = vcombine.high %v2651_v53, %v2683_v41  ;;  %v2688_v12 = vcombine.low %v2644_v25, %v2676_v15  ;;  %4221 = vmatmul.mubr.msk.f32.gmra.mxu0 %vm3264_vm2, %v4988_v26  ;;  %v5047_v25 = vld [vmem:[%s5574_s2 + $0x18] sm:$0xff] }
 0x14b   :  { %v4175_v1 = vcombine.low %v1796_v63, %v1803_v2  ;;  %v2690_v27 = vcombine.low %v2651_v53, %v2683_v41  ;;  %4227 = vmatmul.mubr.msk.f32.gmra.mxu1 %vm3264_vm2, %v4988_v26  ;;  %v2435_v33 = vrot.slane %v4171_v16, %v4425_v32  ;;  %v4177_v22 = vcombine.high %v1796_v63, %v1803_v2 }
 0x14c   :  { %v2451_v43 = vrot.slane %v4173_v62, %v4425_v32  ;;  %3530 = vmatprep.subr.mxu0 %v2689_v36  ;;  %3619 = vmatprep.subr.mxu1 %v2691_v55  ;;  %v5629_v60 = vcombine.low %v4448_v20, %v4451_v21  ;;  %v5630_v23 = vcombine.high %v4448_v20, %v4451_v21 }
 0x14d   :  { %v2467_v61 = vrot.slane %v4175_v1, %v4425_v32  ;;  %v5631_v24 = vcombine.low %v4520_v34, %v4523_v35  ;;  %3531 = vmatpush1.msra.mxu0 %v2688_v12  ;;  %3620 = vmatpush1.msra.mxu1 %v2690_v27  ;;  %v2483_v7 = vrot.slane %v4177_v22, %v4425_v32 }
 0x14e   :  { %v1388_v37 = vrot.slane %v5629_v60, %v4429_v42  ;;  %v1395_v28 = vrot.slane %v5630_v23, %v4429_v42  ;;  %v2500_v13 = vcombine.low %v2435_v33, %v2451_v43  ;;  %v2501_v52 = vcombine.high %v2435_v33, %v2451_v43  ;;  %3402 = vmatprep.mubr.f32.mxu0 %v5616_v3 }
 0x14f   :  { %v1524_v59 = vrot.slane %v5631_v24, %v4429_v42  ;;  %v5632_v20 = vcombine.high %v4520_v34, %v4523_v35  ;;  %3491 = vmatprep.mubr.f32.mxu1 %v5616_v3  ;;  %v2532_v18 = vcombine.low %v2467_v61, %v2483_v7  ;;  %v2533_v38 = vcombine.high %v2467_v61, %v2483_v7 }
 0x150   :  { %v4163_v29 = vcombine.low %v1388_v37, %v1395_v28  ;;  %v4165_v56 = vcombine.high %v1388_v37, %v1395_v28  ;;  %v2508_v46 = vrot.slane %v2500_v13, %v4429_v42  ;;  %v2515_v19 = vrot.slane %v2501_v52, %v4429_v42  ;;  %4222 = vmatmul.mubr.msk.f32.gmra.mxu0 %vm3264_vm2, %v5027_v10 }
 0x151   :  { %v1531_v21 = vrot.slane %v5632_v20, %v4429_v42  ;;  %4228 = vmatmul.mubr.msk.f32.gmra.mxu1 %vm3264_vm2, %v5027_v10  ;;  %v2540_v58 = vrot.slane %v2532_v18, %v4429_v42  ;;  %v2547_v63 = vrot.slane %v2533_v38, %v4429_v42  ;;  %3408 = vmatprep.mubr.f32.mxu0 %v5616_v3 }
 0x152   :  { %v2299_v48 = vrot.slane %v4163_v29, %v4425_v32  ;;  %v2315_v34 = vrot.slane %v4165_v56, %v4425_v32  ;;  %3497 = vmatprep.mubr.f32.mxu1 %v5616_v3  ;;  %v4214_v8 = vcombine.low %v4848_v11, %v4851_v54  ;;  %v4216_v61 = vcombine.high %v4848_v11, %v4851_v54 }
 0x153   :  { %v4167_v35 = vcombine.low %v1524_v59, %v1531_v21  ;;  %v4169_v47 = vcombine.high %v1524_v59, %v1531_v21  ;;  %v2553_v16 = vcombine.high %v2508_v46, %v2540_v58  ;;  %v2555_v62 = vcombine.high %v2515_v19, %v2547_v63 }
 0x154   :  { %v2364_v53 = vcombine.low %v2299_v48, %v2315_v34  ;;  %v2365_v41 = vcombine.high %v2299_v48, %v2315_v34  ;;  %v2552_v1 = vcombine.low %v2508_v46, %v2540_v58  ;;  %v2554_v36 = vcombine.low %v2515_v19, %v2547_v63  ;;  %4223 = vmatmul.mubr.msk.f32.gmra.mxu0 %vm3264_vm2, %v5047_v25 }
 0x155   :  { %v2331_v2 = vrot.slane %v4167_v35, %v4425_v32  ;;  %v2347_v15 = vrot.slane %v4169_v47, %v4425_v32  ;;  %4229 = vmatmul.mubr.msk.f32.gmra.mxu1 %vm3264_vm2, %v5047_v25  ;;  %3532 = vmatprep.subr.mxu0 %v2553_v16  ;;  %v3176_v43 = vrot.slane %v4214_v8, %v4425_v32 }
 0x156   :  { %v2372_v55 = vrot.slane %v2364_v53, %v4429_v42  ;;  %v2379_v27 = vrot.slane %v2365_v41, %v4429_v42  ;;  %3621 = vmatprep.subr.mxu1 %v2555_v62  ;;  %v5633_v22 = vcombine.low %v4724_v39, %v4727_v51  ;;  %3533 = vmatpush1.msra.mxu0 %v2552_v1 }
 0x157   :  { %v2396_v12 = vcombine.low %v2331_v2, %v2347_v15  ;;  %v2397_v33 = vcombine.high %v2331_v2, %v2347_v15  ;;  %3622 = vmatpush1.msra.mxu1 %v2554_v36  ;;  %v5634_v28 = vcombine.high %v4724_v39, %v4727_v51  ;;  %3568 = vmatprep.mubr.f32.mxu0 %v5616_v3 }
 0x158   :  { %v1984_v60 = vrot.slane %v5633_v22, %v4429_v42  ;;  %3657 = vmatprep.mubr.f32.mxu1 %v5616_v3  ;;  %v3192_v11 = vrot.slane %v4216_v61, %v4425_v32  ;;  %v5635_v54 = vcombine.low %v4780_v6, %v4783_v31  ;;  %v5636_v7 = vcombine.high %v4780_v6, %v4783_v31 }
 0x159   :  { %v2404_v37 = vrot.slane %v2396_v12, %v4429_v42  ;;  %v2411_v23 = vrot.slane %v2397_v33, %v4429_v42  ;;  %v1991_v24 = vrot.slane %v5634_v28, %v4429_v42  ;;  %v5637_v38 = vcombine.low %v4612_v14, %v4615_v57 }
 0x15a   :  { %v2120_v59 = vrot.slane %v5635_v54, %v4429_v42  ;;  %v2127_v13 = vrot.slane %v5636_v7, %v4429_v42  ;;  %v3200_v21 = vcombine.low %v3176_v43, %v3192_v11  ;;  %v3201_v29 = vcombine.high %v3176_v43, %v3192_v11 }
 0x15b   :  { %v2417_v52 = vcombine.high %v2372_v55, %v2404_v37  ;;  %v2419_v20 = vcombine.high %v2379_v27, %v2411_v23  ;;  %v2416_v39 = vcombine.low %v2372_v55, %v2404_v37  ;;  %v2418_v51 = vcombine.low %v2379_v27, %v2411_v23 }
 0x15c   :  { %v4206_v56 = vcombine.low %v1984_v60, %v1991_v24  ;;  %v4208_v46 = vcombine.high %v1984_v60, %v1991_v24  ;;  %v4210_v18 = vcombine.low %v2120_v59, %v2127_v13  ;;  %v4212_v19 = vcombine.high %v2120_v59, %v2127_v13 }
 0x15d   :  { %3534 = vmatprep.subr.mxu0 %v2417_v52  ;;  %3623 = vmatprep.subr.mxu1 %v2419_v20  ;;  %v1712_v48 = vrot.slane %v5637_v38, %v4429_v42  ;;  %v3208_v6 = vrot.slane %v3200_v21, %v4429_v42  ;;  %v3215_v31 = vrot.slane %v3201_v29, %v4429_v42 }
 0x15e   :  { %3535 = vmatpush1.msra.mxu0 %v2416_v39  ;;  %3624 = vmatpush1.msra.mxu1 %v2418_v51  ;;  %v3040_v34 = vrot.slane %v4206_v56, %v4425_v32  ;;  %v3056_v35 = vrot.slane %v4208_v46, %v4425_v32  ;;  %v3072_v47 = vrot.slane %v4210_v18, %v4425_v32 }
 0x15f   :  { %4232 = vmatmul.mubr.msk.f32.vlgmr.msra.gmra.mxu0 %vm3264_vm2, %v4961_v9  ;;  %4238 = vmatmul.mubr.msk.f32.vlgmr.msra.gmra.mxu1 %vm3264_vm2, %v4961_v9  ;;  %v3088_v58 = vrot.slane %v4212_v19, %v4425_v32  ;;  %v3232_v63 = vcombine.high %v3208_v6, %v5616_v3  ;;  %v3233_v8 = vcombine.high %v3215_v31, %v5616_v3 }
 0x160   :  { %3574 = vmatprep.mubr.f32.mxu0 %v5616_v3  ;;  %3663 = vmatprep.mubr.f32.mxu1 %v5616_v3  ;;  %v5638_v2 = vcombine.high %v4612_v14, %v4615_v57  ;;  %v3096_v53 = vcombine.low %v3040_v34, %v3056_v35  ;;  %v3097_v16 = vcombine.high %v3040_v34, %v3056_v35 }
 0x161   :  { %v3128_v41 = vcombine.low %v3072_v47, %v3088_v58  ;;  %v3129_v62 = vcombine.high %v3072_v47, %v3088_v58  ;;  %4242 = vmatprep.subr.msk.mxu0 %vm3277_vm1, %v3232_v63  ;;  %4248 = vmatprep.subr.msk.mxu1 %vm3277_vm1, %v3233_v8  ;;  %v5639_v1 = vcombine.low %v4668_v30, %v4671_v50 }
 0x162   :  { %v1719_v15 = vrot.slane %v5638_v2, %v4429_v42  ;;  %v5640_v55 = vcombine.high %v4668_v30, %v4671_v50  ;;  %4243 = vmatpush1.msk.msra.mxu0 %vm3277_vm1, %v3208_v6  ;;  %4249 = vmatpush1.msk.msra.mxu1 %vm3277_vm1, %v3215_v31  ;;  %v3104_v14 = vrot.slane %v3096_v53, %v4429_v42 }
 0x163   :  { %v1848_v36 = vrot.slane %v5639_v1, %v4429_v42  ;;  %v3136_v27 = vrot.slane %v3128_v41, %v4429_v42  ;;  %v3111_v33 = vrot.slane %v3097_v16, %v4429_v42  ;;  %v3143_v43 = vrot.slane %v3129_v62, %v4429_v42  ;;  %4233 = vmatmul.mubr.msk.f32.gmra.mxu0 %vm3264_vm2, %v4988_v26 }
 0x164   :  { %v1855_v12 = vrot.slane %v5640_v55, %v4429_v42  ;;  %v4198_v57 = vcombine.low %v1712_v48, %v1719_v15  ;;  %v4200_v22 = vcombine.high %v1712_v48, %v1719_v15  ;;  %4239 = vmatmul.mubr.msk.f32.gmra.mxu1 %vm3264_vm2, %v4988_v26  ;;  %v5641_v23 = vcombine.low %v4472_v44, %v4475_v45 }
 0x165   :  { %v3161_v30 = vcombine.high %v3104_v14, %v3136_v27  ;;  %v3160_v50 = vcombine.low %v3104_v14, %v3136_v27  ;;  %v3163_v24 = vcombine.high %v3111_v33, %v3143_v43  ;;  %v3162_v11 = vcombine.low %v3111_v33, %v3143_v43  ;;  %3580 = vmatprep.mubr.f32.mxu0 %v5616_v3 }
 0x166   :  { %v2904_v61 = vrot.slane %v4198_v57, %v4425_v32  ;;  %v4202_v60 = vcombine.low %v1848_v36, %v1855_v12  ;;  %v4204_v37 = vcombine.high %v1848_v36, %v1855_v12  ;;  %v1440_v28 = vrot.slane %v5641_v23, %v4429_v42  ;;  %3669 = vmatprep.mubr.f32.mxu1 %v5616_v3 }
 0x167   :  { %v2920_v54 = vrot.slane %v4200_v22, %v4425_v32  ;;  %3708 = vmatprep.subr.mxu0 %v3161_v30  ;;  %v5642_v13 = vcombine.high %v4472_v44, %v4475_v45  ;;  %v5643_v20 = vcombine.low %v4548_v4, %v4551_v5  ;;  %v5644_v51 = vcombine.high %v4548_v4, %v4551_v5 }
 0x168   :  { %v2936_v59 = vrot.slane %v4202_v60, %v4425_v32  ;;  %v2952_v7 = vrot.slane %v4204_v37, %v4425_v32  ;;  %3797 = vmatprep.subr.mxu1 %v3163_v24  ;;  %3709 = vmatpush1.msra.mxu0 %v3160_v50  ;;  %v4215_v46 = vcombine.low %v4854_v0, %v4857_v17 }
 0x169   :  { %v1447_v52 = vrot.slane %v5642_v13, %v4429_v42  ;;  %v1576_v39 = vrot.slane %v5643_v20, %v4429_v42  ;;  %v1583_v21 = vrot.slane %v5644_v51, %v4429_v42  ;;  %v2960_v29 = vcombine.low %v2904_v61, %v2920_v54  ;;  %3798 = vmatpush1.msra.mxu1 %v3162_v11  ;;  %v5652_v51 = vld [vmem:[#allocation7_spill] sm:$0xff] }
 0x16a   :  { %v2961_v56 = vcombine.high %v2904_v61, %v2920_v54  ;;  %v2992_v44 = vcombine.low %v2936_v59, %v2952_v7  ;;  %v2993_v45 = vcombine.high %v2936_v59, %v2952_v7  ;;  %4234 = vmatmul.mubr.msk.f32.gmra.mxu0 %vm3264_vm2, %v5027_v10  ;;  %4240 = vmatmul.mubr.msk.f32.gmra.mxu1 %vm3264_vm2, %v5027_v10 }
 0x16b   :  { %v4190_v18 = vcombine.low %v1440_v28, %v1447_v52  ;;  %v4192_v19 = vcombine.high %v1440_v28, %v1447_v52  ;;  %v2968_v38 = vrot.slane %v2960_v29, %v4429_v42  ;;  %v4194_v6 = vcombine.low %v1576_v39, %v1583_v21  ;;  %3586 = vmatprep.mubr.f32.mxu0 %v5616_v3 }
 0x16c   :  { %v2975_v48 = vrot.slane %v2961_v56, %v4429_v42  ;;  %v4196_v31 = vcombine.high %v1576_v39, %v1583_v21  ;;  %v3000_v4 = vrot.slane %v2992_v44, %v4429_v42  ;;  %v3007_v5 = vrot.slane %v2993_v45, %v4429_v42  ;;  %3675 = vmatprep.mubr.f32.mxu1 %v5616_v3  ;;  %v5651_v39 = vld [vmem:[#allocation6_spill] sm:$0xff] }
 0x16d   :  { %v2768_v34 = vrot.slane %v4190_v18, %v4425_v32  ;;  %v2784_v35 = vrot.slane %v4192_v19, %v4425_v32  ;;  %v2800_v47 = vrot.slane %v4194_v6, %v4425_v32  ;;  %v3183_v63 = vrot.slane %v4215_v46, %v4425_v32 }
 0x16e   :  { %v2816_v58 = vrot.slane %v4196_v31, %v4425_v32  ;;  %v3025_v8 = vcombine.high %v2968_v38, %v3000_v4  ;;  %v3027_v2 = vcombine.high %v2975_v48, %v3007_v5  ;;  %v3024_v15 = vcombine.low %v2968_v38, %v3000_v4  ;;  %4235 = vmatmul.mubr.msk.f32.gmra.mxu0 %vm3264_vm2, %v5047_v25  ;;  %v5655_v4 = vld [vmem:[#allocation8_spill] sm:$0xff] }
 0x16f   :  { %v3026_v53 = vcombine.low %v2975_v48, %v3007_v5  ;;  %v2824_v41 = vcombine.low %v2768_v34, %v2784_v35  ;;  %v2825_v62 = vcombine.high %v2768_v34, %v2784_v35  ;;  %v4217_v36 = vcombine.high %v4854_v0, %v4857_v17  ;;  %4241 = vmatmul.mubr.msk.f32.gmra.mxu1 %vm3264_vm2, %v5047_v25  ;;  %v5656_v5 = vld [vmem:[#allocation9_spill] sm:$0xff] }
 0x170   :  { %v2856_v16 = vcombine.low %v2800_v47, %v2816_v58  ;;  %v2857_v1 = vcombine.high %v2800_v47, %v2816_v58  ;;  %3710 = vmatprep.subr.mxu0 %v3025_v8  ;;  %3799 = vmatprep.subr.mxu1 %v3027_v2  ;;  %v5645_v55 = vcombine.low %v4730_v49, %v4733_v40 }
 0x171   :  { %v5646_v57 = vcombine.high %v4730_v49, %v4733_v40  ;;  %3711 = vmatpush1.msra.mxu0 %v3024_v15  ;;  %3800 = vmatpush1.msra.mxu1 %v3026_v53  ;;  %v2832_v27 = vrot.slane %v2824_v41, %v4429_v42  ;;  %v2839_v43 = vrot.slane %v2825_v62, %v4429_v42  ;;  %v5647_v49 = vld [vmem:[#allocation10_spill] sm:$0xff]  ;;  %v5648_v40 = vld [vmem:[#allocation11_spill] sm:$0xff] }
 0x172   :  { %v2000_v12 = vrot.slane %v5645_v55, %v4429_v42  ;;  %v2864_v33 = vrot.slane %v2856_v16, %v4429_v42  ;;  %v2871_v0 = vrot.slane %v2857_v1, %v4429_v42  ;;  %v3199_v17 = vrot.slane %v4217_v36, %v4425_v32  ;;  %3746 = vmatprep.mubr.f32.mxu0 %v5616_v3 }
 0x173   :  { %v2007_v14 = vrot.slane %v5646_v57, %v4429_v42  ;;  %v5649_v61 = vcombine.low %v5647_v49, %v5648_v40  ;;  %3835 = vmatprep.mubr.f32.mxu1 %v5616_v3  ;;  %v5650_v50 = vcombine.high %v5647_v49, %v5648_v40  ;;  %v5653_v21 = vcombine.low %v5651_v39, %v5652_v51  ;;  %v5659_v57 = vld [vmem:[#allocation2_spill] sm:$0xff] }
 0x174   :  { %v2889_v60 = vcombine.high %v2832_v27, %v2864_v33  ;;  %v2888_v30 = vcombine.low %v2832_v27, %v2864_v33  ;;  %v2891_v23 = vcombine.high %v2839_v43, %v2871_v0  ;;  %v2890_v28 = vcombine.low %v2839_v43, %v2871_v0 }
 0x175   :  { %v2136_v22 = vrot.slane %v5649_v61, %v4429_v42  ;;  %v2143_v37 = vrot.slane %v5650_v50, %v4429_v42  ;;  %v3216_v24 = vcombine.low %v3183_v63, %v3199_v17  ;;  %v3217_v11 = vcombine.high %v3183_v63, %v3199_v17 }
 0x176   :  { %3712 = vmatprep.subr.mxu0 %v2889_v60  ;;  %v4207_v54 = vcombine.low %v2000_v12, %v2007_v14  ;;  %v4209_v59 = vcombine.high %v2000_v12, %v2007_v14  ;;  %3801 = vmatprep.subr.mxu1 %v2891_v23  ;;  %v1728_v29 = vrot.slane %v5653_v21, %v4429_v42  ;;  %v5660_v14 = vld [vmem:[#allocation3_spill] sm:$0xff]  ;;  %v5664_v23 = vld [vmem:[#allocation5_spill] sm:$0xff] }
 0x177   :  { %v4211_v7 = vcombine.low %v2136_v22, %v2143_v37  ;;  %v4213_v13 = vcombine.high %v2136_v22, %v2143_v37  ;;  %3713 = vmatpush1.msra.mxu0 %v2888_v30  ;;  %v3224_v52 = vrot.slane %v3216_v24, %v4429_v42  ;;  %v3231_v20 = vrot.slane %v3217_v11, %v4429_v42  ;;  %v5663_v37 = vld [vmem:[#allocation4_spill] sm:$0xff] }
 0x178   :  { %3802 = vmatpush1.msra.mxu1 %v2890_v28  ;;  %4244 = vmatmul.mubr.msk.f32.vlgmr.msra.gmra.mxu0 %vm3264_vm2, %v4961_v9  ;;  %v3047_v56 = vrot.slane %v4207_v54, %v4425_v32  ;;  %v3063_v46 = vrot.slane %v4209_v59, %v4425_v32  ;;  %v5654_v38 = vcombine.high %v5651_v39, %v5652_v51 }
 0x179   :  { %v3079_v44 = vrot.slane %v4211_v7, %v4425_v32  ;;  %v3234_v45 = vcombine.high %v3224_v52, %v5616_v3  ;;  %v3235_v18 = vcombine.high %v3231_v20, %v5616_v3  ;;  %4250 = vmatmul.mubr.msk.f32.vlgmr.msra.gmra.mxu1 %vm3264_vm2, %v4961_v9  ;;  %v3095_v19 = vrot.slane %v4213_v13, %v4425_v32 }
 0x17a   :  { %v1735_v48 = vrot.slane %v5654_v38, %v4429_v42  ;;  %v3112_v6 = vcombine.low %v3047_v56, %v3063_v46  ;;  %v3113_v31 = vcombine.high %v3047_v56, %v3063_v46  ;;  %v5657_v34 = vcombine.low %v5655_v4, %v5656_v5  ;;  %3752 = vmatprep.mubr.f32.mxu0 %v5616_v3 }
 0x17b   :  { %v5658_v47 = vcombine.high %v5655_v4, %v5656_v5  ;;  %4254 = vmatprep.subr.msk.mxu0 %vm3277_vm1, %v3234_v45  ;;  %4260 = vmatprep.subr.msk.mxu1 %vm3277_vm1, %v3235_v18  ;;  %v3144_v63 = vcombine.low %v3079_v44, %v3095_v19  ;;  %v3145_v8 = vcombine.high %v3079_v44, %v3095_v19 }
 0x17c   :  { %v1864_v35 = vrot.slane %v5657_v34, %v4429_v42  ;;  %v4199_v2 = vcombine.low %v1728_v29, %v1735_v48  ;;  %4255 = vmatpush1.msk.msra.mxu0 %vm3277_vm1, %v3224_v52  ;;  %4261 = vmatpush1.msk.msra.mxu1 %vm3277_vm1, %v3231_v20  ;;  %v3120_v15 = vrot.slane %v3112_v6, %v4429_v42 }
 0x17d   :  { %v1871_v58 = vrot.slane %v5658_v47, %v4429_v42  ;;  %v3127_v53 = vrot.slane %v3113_v31, %v4429_v42  ;;  %v4201_v41 = vcombine.high %v1728_v29, %v1735_v48  ;;  %v3152_v16 = vrot.slane %v3144_v63, %v4429_v42  ;;  %3841 = vmatprep.mubr.f32.mxu1 %v5616_v3 }
 0x17e   :  { %v3159_v62 = vrot.slane %v3145_v8, %v4429_v42  ;;  %v2911_v1 = vrot.slane %v4199_v2, %v4425_v32  ;;  %v5661_v27 = vcombine.low %v5659_v57, %v5660_v14  ;;  %v5662_v43 = vcombine.high %v5659_v57, %v5660_v14  ;;  %4245 = vmatmul.mubr.msk.f32.gmra.mxu0 %vm3264_vm2, %v4988_v26 }
 0x17f   :  { %v4203_v36 = vcombine.low %v1864_v35, %v1871_v58  ;;  %v2927_v55 = vrot.slane %v4201_v41, %v4425_v32  ;;  %v4205_v12 = vcombine.high %v1864_v35, %v1871_v58  ;;  %v3165_v17 = vcombine.high %v3120_v15, %v3152_v16  ;;  %4251 = vmatmul.mubr.msk.f32.gmra.mxu1 %vm3264_vm2, %v4988_v26 }
 0x180   :  { %v1456_v33 = vrot.slane %v5661_v27, %v4429_v42  ;;  %v1463_v0 = vrot.slane %v5662_v43, %v4429_v42  ;;  %v3167_v49 = vcombine.high %v3127_v53, %v3159_v62  ;;  %v3164_v40 = vcombine.low %v3120_v15, %v3152_v16  ;;  %3758 = vmatprep.mubr.f32.mxu0 %v5616_v3 }
 0x181   :  { %v3166_v61 = vcombine.low %v3127_v53, %v3159_v62  ;;  %v2943_v22 = vrot.slane %v4203_v36, %v4425_v32  ;;  %v2959_v60 = vrot.slane %v4205_v12, %v4425_v32  ;;  %v2976_v30 = vcombine.low %v2911_v1, %v2927_v55  ;;  %3886 = vmatprep.subr.mxu0 %v3165_v17 }
 0x182   :  { %v2977_v50 = vcombine.high %v2911_v1, %v2927_v55  ;;  %3975 = vmatprep.subr.mxu1 %v3167_v49  ;;  %v5665_v28 = vcombine.low %v5663_v37, %v5664_v23  ;;  %v5666_v11 = vcombine.high %v5663_v37, %v5664_v23  ;;  %v4191_v59 = vcombine.low %v1456_v33, %v1463_v0 }
 0x183   :  { %3887 = vmatpush1.msra.mxu0 %v3164_v40  ;;  %3976 = vmatpush1.msra.mxu1 %v3166_v61  ;;  %v2984_v7 = vrot.slane %v2976_v30, %v4429_v42  ;;  %v3008_v13 = vcombine.low %v2943_v22, %v2959_v60  ;;  %v3009_v52 = vcombine.high %v2943_v22, %v2959_v60 }
 0x184   :  { %v1592_v24 = vrot.slane %v5665_v28, %v4429_v42  ;;  %v1599_v54 = vrot.slane %v5666_v11, %v4429_v42  ;;  %v2775_v20 = vrot.slane %v4191_v59, %v4425_v32  ;;  %v4193_v39 = vcombine.high %v1456_v33, %v1463_v0  ;;  %3847 = vmatprep.mubr.f32.mxu1 %v5616_v3 }
 0x185   :  { %v3016_v21 = vrot.slane %v3008_v13, %v4429_v42  ;;  %v2991_v29 = vrot.slane %v2977_v50, %v4429_v42  ;;  %4246 = vmatmul.mubr.msk.f32.gmra.mxu0 %vm3264_vm2, %v5027_v10  ;;  %4252 = vmatmul.mubr.msk.f32.gmra.mxu1 %vm3264_vm2, %v5027_v10  ;;  %v3023_v46 = vrot.slane %v3009_v52, %v4429_v42 }
 0x186   :  { %v4195_v51 = vcombine.low %v1592_v24, %v1599_v54  ;;  %v4197_v56 = vcombine.high %v1592_v24, %v1599_v54  ;;  %v2791_v44 = vrot.slane %v4193_v39, %v4425_v32  ;;  %3764 = vmatprep.mubr.f32.mxu0 %v5616_v3  ;;  %3853 = vmatprep.mubr.f32.mxu1 %v5616_v3 }
 0x187   :  { %v3029_v18 = vcombine.high %v2984_v7, %v3016_v21  ;;  %v3028_v19 = vcombine.low %v2984_v7, %v3016_v21  ;;  %v3031_v48 = vcombine.high %v2991_v29, %v3023_v46  ;;  %v3030_v6 = vcombine.low %v2991_v29, %v3023_v46 }
 0x188   :  { %v2807_v45 = vrot.slane %v4195_v51, %v4425_v32  ;;  %v2823_v38 = vrot.slane %v4197_v56, %v4425_v32  ;;  %v2840_v31 = vcombine.low %v2775_v20, %v2791_v44  ;;  %v2841_v4 = vcombine.high %v2775_v20, %v2791_v44 }
 0x189   :  { %3888 = vmatprep.subr.mxu0 %v3029_v18  ;;  %4247 = vmatmul.mubr.msk.f32.gmra.mxu0 %vm3264_vm2, %v5047_v25 }
 0x18a   :  { %v2872_v5 = vcombine.low %v2807_v45, %v2823_v38  ;;  %v2873_v34 = vcombine.high %v2807_v45, %v2823_v38  ;;  %3977 = vmatprep.subr.mxu1 %v3031_v48  ;;  %3889 = vmatpush1.msra.mxu0 %v3028_v19  ;;  %v2848_v35 = vrot.slane %v2840_v31, %v4429_v42 }
 0x18b   :  { %3978 = vmatpush1.msra.mxu1 %v3030_v6  ;;  %v2855_v58 = vrot.slane %v2841_v4, %v4429_v42  ;;  %3924 = vmatprep.mubr.f32.mxu0 %v5616_v3 }
 0x18c   :  { %v2880_v47 = vrot.slane %v2872_v5, %v4429_v42  ;;  %v2887_v32 = vrot.slane %v2873_v34, %v4429_v42  ;;  %4253 = vmatmul.mubr.msk.f32.gmra.mxu1 %vm3264_vm2, %v5047_v25 }
 0x18d   :  { %4013 = vmatprep.mubr.f32.mxu1 %v5616_v3 }
 0x18e   :  { %v2893_v63 = vcombine.high %v2848_v35, %v2880_v47  ;;  %v2895_v8 = vcombine.high %v2855_v58, %v2887_v32  ;;  %v2892_v2 = vcombine.low %v2848_v35, %v2880_v47  ;;  %v2894_v15 = vcombine.low %v2855_v58, %v2887_v32 }
 0x190   :  { %3890 = vmatprep.subr.mxu0 %v2893_v63  ;;  %3979 = vmatprep.subr.mxu1 %v2895_v8 }
 0x191   :  { %3891 = vmatpush1.msra.mxu0 %v2892_v2  ;;  %3980 = vmatpush1.msra.mxu1 %v2894_v15 }
 0x192   :  { %4256 = vmatmul.mubr.msk.f32.vlgmr.msra.gmra.mxu0 %vm3264_vm2, %v4961_v9  ;;  %4262 = vmatmul.mubr.msk.f32.vlgmr.msra.gmra.mxu1 %vm3264_vm2, %v4961_v9 }
 0x193   :  { %3930 = vmatprep.mubr.f32.mxu0 %v5616_v3  ;;  %4019 = vmatprep.mubr.f32.mxu1 %v5616_v3 }
 0x196   :  { %4257 = vmatmul.mubr.msk.f32.gmra.mxu0 %vm3264_vm2, %v4988_v26  ;;  %4263 = vmatmul.mubr.msk.f32.gmra.mxu1 %vm3264_vm2, %v4988_v26 }
 0x197   :  { %3936 = vmatprep.mubr.f32.mxu0 %v5616_v3  ;;  %4025 = vmatprep.mubr.f32.mxu1 %v5616_v3 }
 0x19a   :  { %4258 = vmatmul.mubr.msk.f32.gmra.mxu0 %vm3264_vm2, %v5027_v10  ;;  %4264 = vmatmul.mubr.msk.f32.gmra.mxu1 %vm3264_vm2, %v5027_v10 }
 0x19b   :  { %3942 = vmatprep.mubr.f32.mxu0 %v5616_v3  ;;  %4031 = vmatprep.mubr.f32.mxu1 %v5616_v3 }
 0x19e   :  { %4259 = vmatmul.mubr.msk.f32.gmra.mxu0 %vm3264_vm2, %v5047_v25  ;;  %4265 = vmatmul.mubr.msk.f32.gmra.mxu1 %vm3264_vm2, %v5047_v25 }
 0x1ae   :  { %v5307_v42 = vpop.permute.xlu0 %3246 }
 0x1b2   :  { %v5311_v16 = vpop.permute.xlu0 %3251 }
 0x1b3   :  { %v5328_v12 = vpop.permute.xlu1 %3256 }
 0x1b8   :  { %v5347_v22 = vpop.permute.xlu1 %3261 }
 0x205   :  { %v3392_v9 = vpop.f32.mrf.mxu0 }
 0x206   :  { %v3481_v26 = vpop.f32.mrf.mxu1  ;;  %v3393_v53 = vadd.f32 %v3392_v9, %v5307_v42 }
 0x207   :  { %v3482_v41 = vadd.f32 %v3481_v26, %v5307_v42  ;;  %v3394_v10 = vpop.f32.mrf.mxu0 }
 0x208   :  { %v3483_v62 = vpop.f32.mrf.mxu1  ;;  %v3395_v3 = vadd.f32 %v3394_v10, %v5307_v42  ;;  %4038 = vst [vmem:[%s5575_s4] sm:$0xff] %v3393_v53 }
 0x209   :  { %v3484_v1 = vadd.f32 %v3483_v62, %v5307_v42  ;;  %4040 = vst [vmem:[%s5575_s4 + $0x10] sm:$0xff] %v3482_v41 }
 0x20a   :  { %v3398_v25 = vpop.f32.mrf.mxu0  ;;  %4039 = vst [vmem:[%s5575_s4 + $0x8] sm:$0xff] %v3395_v3 }
 0x20b   :  { %4041 = vst [vmem:[%s5575_s4 + $0x18] sm:$0xff] %v3484_v1  ;;  %v3487_v36 = vpop.f32.mrf.mxu1  ;;  %v3399_v55 = vadd.f32 %v3398_v25, %v5311_v16 }
 0x20c   :  { %v3400_v57 = vpop.f32.mrf.mxu0  ;;  %v3488_v14 = vadd.f32 %v3487_v36, %v5311_v16 }
 0x20d   :  { %v3489_v27 = vpop.f32.mrf.mxu1  ;;  %v3401_v33 = vadd.f32 %v3400_v57, %v5311_v16  ;;  %4054 = vst [vmem:[%s5575_s4 + $0x80] sm:$0xff] %v3399_v55 }
 0x20e   :  { %v3490_v43 = vadd.f32 %v3489_v27, %v5311_v16  ;;  %4056 = vst [vmem:[%s5575_s4 + $0x90] sm:$0xff] %v3488_v14 }
 0x20f   :  { %4055 = vst [vmem:[%s5575_s4 + $0x88] sm:$0xff] %v3401_v33 }
 0x210   :  { %v3404_v0 = vpop.f32.mrf.mxu0  ;;  %4057 = vst [vmem:[%s5575_s4 + $0x98] sm:$0xff] %v3490_v43 }
 0x211   :  { %v3493_v17 = vpop.f32.mrf.mxu1  ;;  %v3405_v49 = vadd.f32 %v3404_v0, %v5328_v12 }
 0x212   :  { %v3406_v40 = vpop.f32.mrf.mxu0  ;;  %v3494_v61 = vadd.f32 %v3493_v17, %v5328_v12 }
 0x213   :  { %v3495_v60 = vpop.f32.mrf.mxu1  ;;  %v3407_v30 = vadd.f32 %v3406_v40, %v5328_v12  ;;  %4070 = vst [vmem:[%s5575_s4 + $0x100] sm:$0xff] %v3405_v49 }
 0x214   :  { %v3496_v50 = vadd.f32 %v3495_v60, %v5328_v12  ;;  %4072 = vst [vmem:[%s5575_s4 + $0x110] sm:$0xff] %v3494_v61  ;;  %v3410_v37 = vpop.f32.mrf.mxu0 }
 0x215   :  { %4071 = vst [vmem:[%s5575_s4 + $0x108] sm:$0xff] %v3407_v30  ;;  %v3499_v23 = vpop.f32.mrf.mxu1  ;;  %v3411_v28 = vadd.f32 %v3410_v37, %v5347_v22 }
 0x216   :  { %4073 = vst [vmem:[%s5575_s4 + $0x118] sm:$0xff] %v3496_v50  ;;  %v3412_v24 = vpop.f32.mrf.mxu0  ;;  %v3500_v11 = vadd.f32 %v3499_v23, %v5347_v22 }
 0x217   :  { %v3501_v54 = vpop.f32.mrf.mxu1  ;;  %v3413_v59 = vadd.f32 %v3412_v24, %v5347_v22  ;;  %4086 = vst [vmem:[%s5575_s4 + $0x180] sm:$0xff] %v3411_v28 }
 0x218   :  { %v3502_v7 = vadd.f32 %v3501_v54, %v5347_v22  ;;  %4088 = vst [vmem:[%s5575_s4 + $0x190] sm:$0xff] %v3500_v11 }
 0x219   :  { %4087 = vst [vmem:[%s5575_s4 + $0x188] sm:$0xff] %v3413_v59 }
 0x21a   :  { %4089 = vst [vmem:[%s5575_s4 + $0x198] sm:$0xff] %v3502_v7 }
 0x21f   :  { %v3570_v13 = vpop.f32.mrf.mxu0  ;;  %v3659_v52 = vpop.f32.mrf.mxu1 }
 0x220   :  { %v3571_v20 = vadd.f32 %v3570_v13, %v5307_v42  ;;  %v3660_v39 = vadd.f32 %v3659_v52, %v5307_v42 }
 0x221   :  { %v3572_v51 = vpop.f32.mrf.mxu0  ;;  %v3661_v21 = vpop.f32.mrf.mxu1 }
 0x222   :  { %4042 = vst [vmem:[%s5575_s4 + $0x20] sm:$0xff] %v3571_v20  ;;  %4044 = vst [vmem:[%s5575_s4 + $0x30] sm:$0xff] %v3660_v39  ;;  %v3573_v29 = vadd.f32 %v3572_v51, %v5307_v42  ;;  %v3662_v56 = vadd.f32 %v3661_v21, %v5307_v42 }
 0x223   :  { %v3576_v46 = vpop.f32.mrf.mxu0 }
 0x224   :  { %4043 = vst [vmem:[%s5575_s4 + $0x28] sm:$0xff] %v3573_v29  ;;  %4045 = vst [vmem:[%s5575_s4 + $0x38] sm:$0xff] %v3662_v56  ;;  %v3577_v44 = vadd.f32 %v3576_v46, %v5311_v16  ;;  %v3665_v45 = vpop.f32.mrf.mxu1 }
 0x225   :  { %v3666_v18 = vadd.f32 %v3665_v45, %v5311_v16  ;;  %v3578_v19 = vpop.f32.mrf.mxu0 }
 0x226   :  { %4058 = vst [vmem:[%s5575_s4 + $0xa0] sm:$0xff] %v3577_v44  ;;  %v3579_v38 = vadd.f32 %v3578_v19, %v5311_v16  ;;  %v3667_v48 = vpop.f32.mrf.mxu1 }
 0x227   :  { %4060 = vst [vmem:[%s5575_s4 + $0xb0] sm:$0xff] %v3666_v18  ;;  %v3668_v6 = vadd.f32 %v3667_v48, %v5311_v16 }
 0x228   :  { %4059 = vst [vmem:[%s5575_s4 + $0xa8] sm:$0xff] %v3579_v38 }
 0x229   :  { %4061 = vst [vmem:[%s5575_s4 + $0xb8] sm:$0xff] %v3668_v6 }
 0x22a   :  { %v3582_v31 = vpop.f32.mrf.mxu0  ;;  %v3671_v5 = vpop.f32.mrf.mxu1 }
 0x22b   :  { %v3583_v4 = vadd.f32 %v3582_v31, %v5328_v12  ;;  %v3672_v34 = vadd.f32 %v3671_v5, %v5328_v12 }
 0x22c   :  { %v3584_v35 = vpop.f32.mrf.mxu0  ;;  %v3673_v58 = vpop.f32.mrf.mxu1 }
 0x22d   :  { %4074 = vst [vmem:[%s5575_s4 + $0x120] sm:$0xff] %v3583_v4  ;;  %v3585_v47 = vadd.f32 %v3584_v35, %v5328_v12  ;;  %4076 = vst [vmem:[%s5575_s4 + $0x130] sm:$0xff] %v3672_v34  ;;  %v3674_v32 = vadd.f32 %v3673_v58, %v5328_v12 }
 0x22e   :  { %v3588_v63 = vpop.f32.mrf.mxu0 }
 0x22f   :  { %4075 = vst [vmem:[%s5575_s4 + $0x128] sm:$0xff] %v3585_v47  ;;  %4077 = vst [vmem:[%s5575_s4 + $0x138] sm:$0xff] %v3674_v32  ;;  %v3677_v8 = vpop.f32.mrf.mxu1  ;;  %v3589_v2 = vadd.f32 %v3588_v63, %v5347_v22 }
 0x230   :  { %v3678_v15 = vadd.f32 %v3677_v8, %v5347_v22  ;;  %v3590_v9 = vpop.f32.mrf.mxu0 }
 0x231   :  { %v3679_v26 = vpop.f32.mrf.mxu1  ;;  %4090 = vst [vmem:[%s5575_s4 + $0x1a0] sm:$0xff] %v3589_v2  ;;  %v3591_v53 = vadd.f32 %v3590_v9, %v5347_v22 }
 0x232   :  { %4092 = vst [vmem:[%s5575_s4 + $0x1b0] sm:$0xff] %v3678_v15  ;;  %v3680_v41 = vadd.f32 %v3679_v26, %v5347_v22 }
 0x233   :  { %4091 = vst [vmem:[%s5575_s4 + $0x1a8] sm:$0xff] %v3591_v53 }
 0x234   :  { %4093 = vst [vmem:[%s5575_s4 + $0x1b8] sm:$0xff] %v3680_v41 }
 0x238   :  { %v3748_v10 = vpop.f32.mrf.mxu0 }
 0x239   :  { %v3749_v62 = vadd.f32 %v3748_v10, %v5307_v42  ;;  %v3837_v3 = vpop.f32.mrf.mxu1 }
 0x23a   :  { %v3838_v1 = vadd.f32 %v3837_v3, %v5307_v42  ;;  %v3750_v25 = vpop.f32.mrf.mxu0 }
 0x23b   :  { %4046 = vst [vmem:[%s5575_s4 + $0x40] sm:$0xff] %v3749_v62  ;;  %v3751_v36 = vadd.f32 %v3750_v25, %v5307_v42  ;;  %v3839_v55 = vpop.f32.mrf.mxu1 }
 0x23c   :  { %4048 = vst [vmem:[%s5575_s4 + $0x50] sm:$0xff] %v3838_v1  ;;  %v3840_v57 = vadd.f32 %v3839_v55, %v5307_v42 }
 0x23d   :  { %4047 = vst [vmem:[%s5575_s4 + $0x48] sm:$0xff] %v3751_v36 }
 0x23e   :  { %4049 = vst [vmem:[%s5575_s4 + $0x58] sm:$0xff] %v3840_v57  ;;  %v3754_v14 = vpop.f32.mrf.mxu0 }
 0x23f   :  { %v3755_v27 = vadd.f32 %v3754_v14, %v5311_v16  ;;  %v3843_v33 = vpop.f32.mrf.mxu1 }
 0x240   :  { %v3844_v43 = vadd.f32 %v3843_v33, %v5311_v16  ;;  %v3756_v0 = vpop.f32.mrf.mxu0 }
 0x241   :  { %4062 = vst [vmem:[%s5575_s4 + $0xc0] sm:$0xff] %v3755_v27  ;;  %v3757_v17 = vadd.f32 %v3756_v0, %v5311_v16  ;;  %v3845_v49 = vpop.f32.mrf.mxu1 }
 0x242   :  { %4064 = vst [vmem:[%s5575_s4 + $0xd0] sm:$0xff] %v3844_v43  ;;  %v3846_v40 = vadd.f32 %v3845_v49, %v5311_v16 }
 0x243   :  { %4063 = vst [vmem:[%s5575_s4 + $0xc8] sm:$0xff] %v3757_v17 }
 0x244   :  { %4065 = vst [vmem:[%s5575_s4 + $0xd8] sm:$0xff] %v3846_v40 }
 0x245   :  { %v3760_v61 = vpop.f32.mrf.mxu0  ;;  %v3849_v60 = vpop.f32.mrf.mxu1 }
 0x246   :  { %v3761_v30 = vadd.f32 %v3760_v61, %v5328_v12  ;;  %v3850_v50 = vadd.f32 %v3849_v60, %v5328_v12 }
 0x247   :  { %v3762_v37 = vpop.f32.mrf.mxu0  ;;  %v3851_v23 = vpop.f32.mrf.mxu1 }
 0x248   :  { %4078 = vst [vmem:[%s5575_s4 + $0x140] sm:$0xff] %v3761_v30  ;;  %4080 = vst [vmem:[%s5575_s4 + $0x150] sm:$0xff] %v3850_v50  ;;  %v3763_v28 = vadd.f32 %v3762_v37, %v5328_v12  ;;  %v3852_v24 = vadd.f32 %v3851_v23, %v5328_v12 }
 0x249   :  { %v3766_v11 = vpop.f32.mrf.mxu0 }
 0x24a   :  { %4079 = vst [vmem:[%s5575_s4 + $0x148] sm:$0xff] %v3763_v28  ;;  %4081 = vst [vmem:[%s5575_s4 + $0x158] sm:$0xff] %v3852_v24  ;;  %v3767_v54 = vadd.f32 %v3766_v11, %v5347_v22 }
 0x24b   :  { %v3768_v59 = vpop.f32.mrf.mxu0 }
 0x24c   :  { %4094 = vst [vmem:[%s5575_s4 + $0x1c0] sm:$0xff] %v3767_v54  ;;  %v3855_v7 = vpop.f32.mrf.mxu1  ;;  %v3769_v13 = vadd.f32 %v3768_v59, %v5347_v22 }
 0x24d   :  { %v3856_v52 = vadd.f32 %v3855_v7, %v5347_v22 }
 0x24e   :  { %4095 = vst [vmem:[%s5575_s4 + $0x1c8] sm:$0xff] %v3769_v13  ;;  %v3857_v20 = vpop.f32.mrf.mxu1 }
 0x24f   :  { %4096 = vst [vmem:[%s5575_s4 + $0x1d0] sm:$0xff] %v3856_v52  ;;  %v3858_v39 = vadd.f32 %v3857_v20, %v5347_v22 }
 0x251   :  { %4097 = vst [vmem:[%s5575_s4 + $0x1d8] sm:$0xff] %v3858_v39 }
 0x252   :  { %v3926_v51 = vpop.f32.mrf.mxu0  ;;  %v4015_v21 = vpop.f32.mrf.mxu1 }
 0x253   :  { %v3927_v29 = vadd.f32 %v3926_v51, %v5307_v42  ;;  %v4016_v56 = vadd.f32 %v4015_v21, %v5307_v42 }
 0x254   :  { %v3928_v46 = vpop.f32.mrf.mxu0  ;;  %v4017_v44 = vpop.f32.mrf.mxu1 }
 0x255   :  { %4050 = vst [vmem:[%s5575_s4 + $0x60] sm:$0xff] %v3927_v29  ;;  %4052 = vst [vmem:[%s5575_s4 + $0x70] sm:$0xff] %v4016_v56  ;;  %v3929_v45 = vadd.f32 %v3928_v46, %v5307_v42  ;;  %v4018_v18 = vadd.f32 %v4017_v44, %v5307_v42 }
 0x256   :  { %v3932_v19 = vpop.f32.mrf.mxu0  ;;  %v4021_v38 = vpop.f32.mrf.mxu1 }
 0x257   :  { %4051 = vst [vmem:[%s5575_s4 + $0x68] sm:$0xff] %v3929_v45  ;;  %4053 = vst [vmem:[%s5575_s4 + $0x78] sm:$0xff] %v4018_v18  ;;  %v3933_v48 = vadd.f32 %v3932_v19, %v5311_v16  ;;  %v4022_v6 = vadd.f32 %v4021_v38, %v5311_v16 }
 0x258   :  { %v3934_v31 = vpop.f32.mrf.mxu0  ;;  %v4023_v4 = vpop.f32.mrf.mxu1 }
 0x259   :  { %4066 = vst [vmem:[%s5575_s4 + $0xe0] sm:$0xff] %v3933_v48  ;;  %4068 = vst [vmem:[%s5575_s4 + $0xf0] sm:$0xff] %v4022_v6  ;;  %v3935_v42 = vadd.f32 %v3934_v31, %v5311_v16  ;;  %v4024_v5 = vadd.f32 %v4023_v4, %v5311_v16 }
 0x25a   :  { %v3938_v34 = vpop.f32.mrf.mxu0  ;;  %v4027_v35 = vpop.f32.mrf.mxu1 }
 0x25b   :  { %4067 = vst [vmem:[%s5575_s4 + $0xe8] sm:$0xff] %v3935_v42  ;;  %4069 = vst [vmem:[%s5575_s4 + $0xf8] sm:$0xff] %v4024_v5  ;;  %v3939_v47 = vadd.f32 %v3938_v34, %v5328_v12  ;;  %v4028_v58 = vadd.f32 %v4027_v35, %v5328_v12 }
 0x25c   :  { %v3940_v32 = vpop.f32.mrf.mxu0  ;;  %v4029_v63 = vpop.f32.mrf.mxu1 }
 0x25d   :  { %4082 = vst [vmem:[%s5575_s4 + $0x160] sm:$0xff] %v3939_v47  ;;  %4084 = vst [vmem:[%s5575_s4 + $0x170] sm:$0xff] %v4028_v58  ;;  %v3941_v16 = vadd.f32 %v3940_v32, %v5328_v12  ;;  %v4030_v8 = vadd.f32 %v4029_v63, %v5328_v12 }
 0x25e   :  { %v3944_v2 = vpop.f32.mrf.mxu0  ;;  %v4033_v15 = vpop.f32.mrf.mxu1 }
 0x25f   :  { %4083 = vst [vmem:[%s5575_s4 + $0x168] sm:$0xff] %v3941_v16  ;;  %4085 = vst [vmem:[%s5575_s4 + $0x178] sm:$0xff] %v4030_v8  ;;  %v3945_v9 = vadd.f32 %v3944_v2, %v5347_v22  ;;  %v4034_v26 = vadd.f32 %v4033_v15, %v5347_v22 }
 0x260   :  { %v3946_v53 = vpop.f32.mrf.mxu0  ;;  %v4035_v41 = vpop.f32.mrf.mxu1 }
 0x261   :  { %4098 = vst [vmem:[%s5575_s4 + $0x1e0] sm:$0xff] %v3945_v9  ;;  %4100 = vst [vmem:[%s5575_s4 + $0x1f0] sm:$0xff] %v4034_v26  ;;  %v3947_v12 = vadd.f32 %v3946_v53, %v5347_v22  ;;  %v4036_v10 = vadd.f32 %v4035_v41, %v5347_v22 }
 0x263   :  { %4099 = vst [vmem:[%s5575_s4 + $0x1e8] sm:$0xff] %v3947_v12  ;;  %4101 = vst [vmem:[%s5575_s4 + $0x1f8] sm:$0xff] %v4036_v10 }

</bundles_post_ra>
